<compile_context>
chip_gen: v6e
topology: v6e:2x2x1
jax: 0.10.0
libtpu: 0.0.40
codegen_flags: <defaults>
</compile_context>

<pallas_src>
import functools
import math

import jax
import jax.numpy as jnp
from jax.experimental import pallas as pl
from jax.experimental.pallas import tpu as pltpu


def _round_up(n, m):
    return ((n + m - 1) // m) * m


def _fused_out_width(num_classes):
    """Per-pixel fused output width: [class logits | 4 box | pad]."""
    outw = num_classes + 4
    if outw <= 128:
        return max(8, 1 << (outw - 1).bit_length())   # small power of two
    return _round_up(outw, 128)                       # lane-dense for big num_classes


# ------------------------------- kernel --------------------------------------

def _detection_head_kernel(x_ref,    # (Bt, H, W, C)      bf16 input tile
                           w1_ref,   # (9*C, Cp)          bf16 fused 3x3 weights (tap-major)
                           b1_ref,   # (1, Cp)            f32  fused 3x3 biases
                           w2_ref,   # (Cp, P)            bf16 block-diagonal fused 1x1 weights
                           b2_ref,   # (1, P)             f32  fused 1x1 biases
                           out_ref,  # (Bt, H*W, P)       f32  [class | box(sigmoid) | pad]
                           xp_ref,   # scratch (Bt, H+2, W+2, C) bf16 zero-padded input
                           *, num_classes):
    Bt, H, W, C = x_ref.shape
    M = Bt * H * W
    Cp = w1_ref.shape[1]
    P = out_ref.shape[-1]
    cdt = xp_ref.dtype

    # --- zero-padded input: write only the 1-pixel halo + the interior once ---
    # (halo re-zeroed every step: scratch is per-core and grid steps may be split
    #  across TensorCores, so we cannot gate this on program_id == 0)
    xp_ref[:, 0:1, :, :] = jnp.zeros((Bt, 1, W + 2, C), cdt)
    xp_ref[:, H + 1:H + 2, :, :] = jnp.zeros((Bt, 1, W + 2, C), cdt)
    xp_ref[:, 1:H + 1, 0:1, :] = jnp.zeros((Bt, H, 1, C), cdt)
    xp_ref[:, 1:H + 1, W + 1:W + 2, :] = jnp.zeros((Bt, H, 1, C), cdt)
    xp_ref[:, 1:H + 1, 1:W + 1, :] = x_ref[...]           # already bf16, no cast pass

    # --- fused 3x3 convs (class + box heads): 9-tap MXU accumulation, f32 acc --
    hid = jnp.zeros((M, Cp), jnp.float32)
    for kh in range(3):
        for kw in range(3):
            t = kh * 3 + kw
            tap = xp_ref[:, kh:kh + H, kw:kw + W, :].reshape(M, C)
            hid = hid + jnp.dot(tap, w1_ref[t * C:(t + 1) * C, :],
                                preferred_element_type=jnp.float32)
    hid = jnp.maximum(hid + b1_ref[...], 0.0)              # bias + ReLU

    # --- fused 1x1 heads (block-diagonal): (M, Cp) @ (Cp, P), P is narrow ------
    out = jnp.dot(hid.astype(w2_ref.dtype), w2_ref[...],
                  preferred_element_type=jnp.float32) + b2_ref[...]

    # sigmoid only on the 4 box columns [NC, NC+4); class logits pass through.
    col = jax.lax.broadcasted_iota(jnp.int32, out.shape, dimension=1)
    is_box = (col >= num_classes) & (col < num_classes + 4)
    out = jnp.where(is_box, jax.nn.sigmoid(out), out)

    out_ref[...] = out.reshape(Bt, H * W, P)


# --------------------------- tiling / budgets ---------------------------------

def _padded_bytes(shape, dtype_bytes):
    """Rough VMEM footprint with (sublane, lane) tile padding."""
    if len(shape) < 2:
        return _round_up(int(shape[-1]) if shape else 1, 128) * dtype_bytes
    sub = 8 * 4 // dtype_bytes          # 8 sublanes for f32, 16 for bf16
    lead = 1
    for d in shape[:-2]:
        lead *= int(d)
    return lead * _round_up(int(shape[-2]), sub) * _round_up(int(shape[-1]), 128) * dtype_bytes


def _per_image_vmem(H, W, C, Cp, P):
    b = 2 * _padded_bytes((1, H, W, C), 2)              # input block (double buffered)
    b += 2 * _padded_bytes((1, H * W, P), 4)            # output block (double buffered)
    b += _padded_bytes((1, H + 2, W + 2, C), 2)         # padded-input scratch
    b += _padded_bytes((H * W, Cp), 4)                  # f32 hidden accumulator
    b += _padded_bytes((H * W, C), 2)                   # one tap window in flight
    b += _padded_bytes((H * W, P), 4)                   # fused 1x1 output value
    return b


def _pick_batch_tile(B, per_img_bytes, fixed_bytes, rows_per_img,
                     vmem_budget=40 << 20, target_rows=512):
    """Divisor of B: fits the VMEM budget, prefers >=2 grid steps (2 TensorCores /
    pipelining) and >= target_rows MXU rows per step when the batch allows it."""
    budget = max(vmem_budget - fixed_bytes, per_img_bytes)
    divisors = [d for d in range(1, B + 1) if B % d == 0]
    fit = [d for d in divisors if d * per_img_bytes <= budget] or [1]
    cand = [d for d in fit if B // d >= 2] or fit
    good = [d for d in cand if d * rows_per_img >= target_rows]
    return min(good) if good else max(cand)


# ------------------------------- wrapper --------------------------------------

def detection_head_forward(x, packed_params, num_classes):
    """x: (B, N, C) float32.  Returns (logits NCHW, bboxes NCHW) like PyTorch."""
    B, N, C = x.shape
    H = W = int(math.isqrt(N))
    assert H * W == N, "N must be a perfect square"

    w1, b1, w2, b2 = packed_params
    Cp = w1.shape[1]
    P = w2.shape[1]
    cdt = w1.dtype
    assert w1.shape == (9 * C, Cp)

    # bf16 NHWC input: halves the HBM read and the double-buffered input block.
    # (equivalent to PyTorch's x.transpose(1,2).reshape(B,C,H,W) but channels-last)
    x_nhwc = x.reshape(B, H, W, C).astype(cdt)

    per_img = _per_image_vmem(H, W, C, Cp, P)
    fixed = (2 * (_padded_bytes((9 * C, Cp), 2) + _padded_bytes((Cp, P), 2))
             + _padded_bytes((1, Cp), 4) + _padded_bytes((1, P), 4))
    Bt = _pick_batch_tile(B, per_img, fixed, H * W)
    num_tiles = B // Bt
    vmem_limit = int(min(56 << 20, max(32 << 20, 2 * (fixed + Bt * per_img))))

    kernel = functools.partial(_detection_head_kernel, num_classes=num_classes)

    out = pl.pallas_call(
        kernel,
        out_shape=jax.ShapeDtypeStruct((B, H * W, P), jnp.float32),
        grid_spec=pltpu.PrefetchScalarGridSpec(
            num_scalar_prefetch=0,
            grid=(num_tiles,),
            in_specs=[
                pl.BlockSpec((Bt, H, W, C), lambda b: (b, 0, 0, 0)),
                pl.BlockSpec(w1.shape, lambda b: (0, 0)),
                pl.BlockSpec(b1.shape, lambda b: (0, 0)),
                pl.BlockSpec(w2.shape, lambda b: (0, 0)),
                pl.BlockSpec(b2.shape, lambda b: (0, 0)),
            ],
            out_specs=pl.BlockSpec((Bt, H * W, P), lambda b: (b, 0, 0)),
            scratch_shapes=[
                pltpu.VMEM((Bt, H + 2, W + 2, C), cdt),   # zero-padded input
            ],
        ),
        compiler_params=pltpu.CompilerParams(
            dimension_semantics=("parallel",),
            vmem_limit_bytes=vmem_limit),
    )(x_nhwc, w1, b1, w2, b2)

    # slice the narrow fused output BEFORE transposing (no relayout of padded lanes),
    # then return PyTorch's NCHW convention.
    logits = out[:, :, :num_classes].reshape(B, H, W, num_classes)
    bboxes = out[:, :, num_classes:num_classes + 4].reshape(B, H, W, 4)
    return jnp.transpose(logits, (0, 3, 1, 2)), jnp.transpose(bboxes, (0, 3, 1, 2))


# ----------------------------- parameters ------------------------------------

def _xavier_uniform(key, out_ch, in_ch, kh, kw):
    """Matches nn.init.xavier_uniform_ for Conv2d weight (out, in, kh, kw)."""
    fan_in = in_ch * kh * kw
    fan_out = out_ch * kh * kw
    bound = math.sqrt(6.0 / (fan_in + fan_out))
    return jax.random.uniform(key, (out_ch, in_ch, kh, kw),
                              minval=-bound, maxval=bound, dtype=jnp.float32)


def init_raw_params(key, embed_dim, num_classes):
    """Per-head f32 weights: 3x3 in HWIO, 1x1 as (Cin, Cout); biases zero (as in PyTorch)."""
    C = embed_dim
    k1, k2, k3, k4 = jax.random.split(key, 4)
    w1c = jnp.transpose(_xavier_uniform(k1, C, C, 3, 3), (2, 3, 1, 0))
    w2c = jnp.transpose(_xavier_uniform(k2, num_classes, C, 1, 1)[:, :, 0, 0], (1, 0))
    w1b = jnp.transpose(_xavier_uniform(k3, C, C, 3, 3), (2, 3, 1, 0))
    w2b = jnp.transpose(_xavier_uniform(k4, 4, C, 1, 1)[:, :, 0, 0], (1, 0))
    b1c = jnp.zeros((C,), jnp.float32)
    b2c = jnp.zeros((num_classes,), jnp.float32)
    b1b = jnp.zeros((C,), jnp.float32)
    b2b = jnp.zeros((4,), jnp.float32)
    return (w1c, b1c, w2c, b2c, w1b, b1b, w2b, b2b)


def pack_params(raw, embed_dim, num_classes, compute_dtype=jnp.bfloat16):
    """Fuse class+box heads into kernel-ready tensors."""
    C, NC = embed_dim, num_classes
    (w1c, b1c, w2c, b2c, w1b, b1b, w2b, b2b) = raw
    Cp = _round_up(2 * C, 128)            # fused 3x3 Cout, padded to full MXU lanes
    P = _fused_out_width(NC)              # narrow fused per-pixel output width

    w1 = jnp.zeros((3, 3, C, Cp), jnp.float32)
    w1 = w1.at[:, :, :, :C].set(w1c)
    w1 = w1.at[:, :, :, C:2 * C].set(w1b)
    w1 = w1.reshape(9 * C, Cp).astype(compute_dtype)      # tap-major im2col layout

    b1 = jnp.zeros((1, Cp), jnp.float32)
    b1 = b1.at[0, :C].set(b1c)
    b1 = b1.at[0, C:2 * C].set(b1b)

    w2 = jnp.zeros((Cp, P), jnp.float32)                  # block-diagonal 1x1 weights
    w2 = w2.at[:C, :NC].set(w2c)
    w2 = w2.at[C:2 * C, NC:NC + 4].set(w2b)
    w2 = w2.astype(compute_dtype)

    b2 = jnp.zeros((1, P), jnp.float32)
    b2 = b2.at[0, :NC].set(b2c)
    b2 = b2.at[0, NC:NC + 4].set(b2b)
    return (w1, b1, w2, b2)


# ----------------------------- reference -------------------------------------

def _reference_forward(x, raw, num_classes, compute_dtype=jnp.bfloat16):
    """Pure-JAX (lax.conv) reference with the same bf16 operand rounding as the kernel."""
    B, N, C = x.shape
    H = W = int(math.isqrt(N))
    cd = lambda a: a.astype(compute_dtype).astype(jnp.float32)
    x_nhwc = cd(x.reshape(B, H, W, C))
    (w1c, b1c, w2c, b2c, w1b, b1b, w2b, b2b) = raw
    dn = jax.lax.conv_dimension_numbers(x_nhwc.shape, w1c.shape,
                                        ("NHWC", "HWIO", "NHWC"))

    def head(w1, b1, w2, b2, act):
        h = jax.lax.conv_general_dilated(x_nhwc, cd(w1), (1, 1), "SAME",
                                         dimension_numbers=dn)
        h = jnp.maximum(h + b1.reshape(1, 1, 1, -1), 0.0)
        o = jnp.einsum("bhwc,cd->bhwd", cd(h), cd(w2)) + b2.reshape(1, 1, 1, -1)
        return act(jnp.transpose(o, (0, 3, 1, 2)))

    logits = head(w1c, b1c, w2c, b2c, lambda z: z)
    boxes = head(w1b, b1b, w2b, b2b, jax.nn.sigmoid)
    return logits, boxes


if __name__ == "__main__":
    B, embed_dim, num_classes = 2, 32, 2
    H = W = 8
    N = H * W

    key = jax.random.PRNGKey(0)
    kx, kp = jax.random.split(key)
    x = jax.random.normal(kx, (B, N, embed_dim), dtype=jnp.float32)

    raw = init_raw_params(kp, embed_dim, num_classes)
    packed = pack_params(raw, embed_dim, num_classes, compute_dtype=jnp.bfloat16)

    logits, bboxes = detection_head_forward(x, packed, num_classes)
    jax.block_until_ready((logits, bboxes))

    assert logits.shape == (B, num_classes, H, W)
    assert bboxes.shape == (B, 4, H, W)

    # sanity-check against a plain-JAX conv reference (same bf16 operand rounding)
    ref_logits, ref_boxes = _reference_forward(x, raw, num_classes)
    assert jnp.allclose(logits, ref_logits, atol=2e-3, rtol=2e-3), \
        float(jnp.max(jnp.abs(logits - ref_logits)))
    assert jnp.allclose(bboxes, ref_boxes, atol=2e-3, rtol=2e-3), \
        float(jnp.max(jnp.abs(bboxes - ref_boxes)))

    print("KERNEL_OK")
</pallas_src>

<mosaic_0001>
module attributes {stable_mosaic.version = 11 : i64} {
  func.func @_detection_head_kernel(%arg0: i32, %arg1: memref<1x8x8x32xbf16, #tpu.memory_space<vmem>>, %arg2: memref<288x128xbf16, #tpu.memory_space<vmem>>, %arg3: memref<1x128xf32, #tpu.memory_space<vmem>>, %arg4: memref<128x8xbf16, #tpu.memory_space<vmem>>, %arg5: memref<1x8xf32, #tpu.memory_space<vmem>>, %arg6: memref<1x64x8xf32, #tpu.memory_space<vmem>>, %arg7: memref<1x10x10x32xbf16, #tpu.memory_space<vmem>>) attributes {dimension_semantics = [#tpu.dimension_semantics<parallel>], iteration_bounds = array<i64: 2>, scalar_prefetch = 0 : i64, scratch_operands = 1 : i64, tpu.core_type = #tpu.core_type<tc>, window_params = [{transform_indices = @transform_0, window_bounds = array<i64: 1, 8, 8, 32>}, {pipeline_mode = #tpu.pipeline_mode<synchronous>, transform_indices = @transform_1, window_bounds = array<i64: 288, 128>}, {pipeline_mode = #tpu.pipeline_mode<synchronous>, transform_indices = @transform_2, window_bounds = array<i64: 1, 128>}, {pipeline_mode = #tpu.pipeline_mode<synchronous>, transform_indices = @transform_3, window_bounds = array<i64: 128, 8>}, {pipeline_mode = #tpu.pipeline_mode<synchronous>, transform_indices = @transform_4, window_bounds = array<i64: 1, 8>}, {transform_indices = @transform_5, window_bounds = array<i64: 1, 64, 8>}]} {
    %cst = arith.constant 0.000000e+00 : bf16
    %0 = vector.broadcast %cst : bf16 to vector<1x1x10x32xbf16>
    %c0 = arith.constant 0 : index
    %c0_0 = arith.constant 0 : index
    %c0_1 = arith.constant 0 : index
    %c0_2 = arith.constant 0 : index
    %1 = vector.load %arg7[%c0, %c0_0, %c0_1, %c0_2] : memref<1x10x10x32xbf16, #tpu.memory_space<vmem>>, vector<1x1x10x32xbf16>
    tpu.vector_store %arg7[%c0, %c0_0, %c0_1, %c0_2], %0 {strides = array<i32>} : memref<1x10x10x32xbf16, #tpu.memory_space<vmem>>, vector<1x1x10x32xbf16>,
    %cst_3 = arith.constant 0.000000e+00 : bf16
    %2 = vector.broadcast %cst_3 : bf16 to vector<1x1x10x32xbf16>
    %c0_4 = arith.constant 0 : index
    %c9 = arith.constant 9 : index
    %c0_5 = arith.constant 0 : index
    %c0_6 = arith.constant 0 : index
    %3 = vector.load %arg7[%c0_4, %c9, %c0_5, %c0_6] : memref<1x10x10x32xbf16, #tpu.memory_space<vmem>>, vector<1x1x10x32xbf16>
    tpu.vector_store %arg7[%c0_4, %c9, %c0_5, %c0_6], %2 {strides = array<i32>} : memref<1x10x10x32xbf16, #tpu.memory_space<vmem>>, vector<1x1x10x32xbf16>,
    %cst_7 = arith.constant 0.000000e+00 : bf16
    %4 = vector.broadcast %cst_7 : bf16 to vector<1x8x1x32xbf16>
    %c0_8 = arith.constant 0 : index
    %c1 = arith.constant 1 : index
    %c0_9 = arith.constant 0 : index
    %c0_10 = arith.constant 0 : index
    %5 = vector.load %arg7[%c0_8, %c1, %c0_9, %c0_10] : memref<1x10x10x32xbf16, #tpu.memory_space<vmem>>, vector<1x8x1x32xbf16>
    tpu.vector_store %arg7[%c0_8, %c1, %c0_9, %c0_10], %4 {strides = array<i32>} : memref<1x10x10x32xbf16, #tpu.memory_space<vmem>>, vector<1x8x1x32xbf16>,
    %cst_11 = arith.constant 0.000000e+00 : bf16
    %6 = vector.broadcast %cst_11 : bf16 to vector<1x8x1x32xbf16>
    %c0_12 = arith.constant 0 : index
    %c1_13 = arith.constant 1 : index
    %c9_14 = arith.constant 9 : index
    %c0_15 = arith.constant 0 : index
    %7 = vector.load %arg7[%c0_12, %c1_13, %c9_14, %c0_15] : memref<1x10x10x32xbf16, #tpu.memory_space<vmem>>, vector<1x8x1x32xbf16>
    tpu.vector_store %arg7[%c0_12, %c1_13, %c9_14, %c0_15], %6 {strides = array<i32>} : memref<1x10x10x32xbf16, #tpu.memory_space<vmem>>, vector<1x8x1x32xbf16>,
    %c0_16 = arith.constant 0 : index
    %c0_17 = arith.constant 0 : index
    %c0_18 = arith.constant 0 : index
    %c0_19 = arith.constant 0 : index
    %8 = vector.load %arg1[%c0_16, %c0_17, %c0_18, %c0_19] : memref<1x8x8x32xbf16, #tpu.memory_space<vmem>>, vector<1x8x8x32xbf16>
    %c0_20 = arith.constant 0 : index
    %c1_21 = arith.constant 1 : index
    %c1_22 = arith.constant 1 : index
    %c0_23 = arith.constant 0 : index
    %9 = vector.load %arg7[%c0_20, %c1_21, %c1_22, %c0_23] : memref<1x10x10x32xbf16, #tpu.memory_space<vmem>>, vector<1x8x8x32xbf16>
    tpu.vector_store %arg7[%c0_20, %c1_21, %c1_22, %c0_23], %8 {strides = array<i32>} : memref<1x10x10x32xbf16, #tpu.memory_space<vmem>>, vector<1x8x8x32xbf16>,
    %cst_24 = arith.constant 0.000000e+00 : f32
    %10 = vector.broadcast %cst_24 : f32 to vector<64x128xf32>
    %c0_25 = arith.constant 0 : index
    %c0_26 = arith.constant 0 : index
    %c0_27 = arith.constant 0 : index
    %c0_28 = arith.constant 0 : index
    %11 = vector.load %arg7[%c0_25, %c0_26, %c0_27, %c0_28] : memref<1x10x10x32xbf16, #tpu.memory_space<vmem>>, vector<1x8x8x32xbf16>
    %12 = vector.shape_cast %11 : vector<1x8x8x32xbf16> to vector<64x32xbf16>
    %c0_29 = arith.constant 0 : index
    %c0_30 = arith.constant 0 : index
    %13 = vector.load %arg2[%c0_29, %c0_30] : memref<288x128xbf16, #tpu.memory_space<vmem>>, vector<32x128xbf16>
    %cst_31 = arith.constant dense<0.000000e+00> : vector<64x128xf32>
    %14 = tpu.matmul %12, %13, %cst_31 {dimension_numbers = #tpu.dot_dimension_numbers<[1], [0], [0], [1], [0, 0, 1, 1], [], []>} : vector<64x32xbf16>, vector<32x128xbf16>, vector<64x128xf32> -> vector<64x128xf32>
    %15 = arith.addf %10, %14 : vector<64x128xf32>
    %c0_32 = arith.constant 0 : index
    %c0_33 = arith.constant 0 : index
    %c1_34 = arith.constant 1 : index
    %c0_35 = arith.constant 0 : index
    %16 = vector.load %arg7[%c0_32, %c0_33, %c1_34, %c0_35] : memref<1x10x10x32xbf16, #tpu.memory_space<vmem>>, vector<1x8x8x32xbf16>
    %17 = vector.shape_cast %16 : vector<1x8x8x32xbf16> to vector<64x32xbf16>
    %c32 = arith.constant 32 : index
    %c0_36 = arith.constant 0 : index
    %18 = vector.load %arg2[%c32, %c0_36] : memref<288x128xbf16, #tpu.memory_space<vmem>>, vector<32x128xbf16>
    %cst_37 = arith.constant dense<0.000000e+00> : vector<64x128xf32>
    %19 = tpu.matmul %17, %18, %cst_37 {dimension_numbers = #tpu.dot_dimension_numbers<[1], [0], [0], [1], [0, 0, 1, 1], [], []>} : vector<64x32xbf16>, vector<32x128xbf16>, vector<64x128xf32> -> vector<64x128xf32>
    %20 = arith.addf %15, %19 : vector<64x128xf32>
    %c0_38 = arith.constant 0 : index
    %c0_39 = arith.constant 0 : index
    %c2 = arith.constant 2 : index
    %c0_40 = arith.constant 0 : index
    %21 = vector.load %arg7[%c0_38, %c0_39, %c2, %c0_40] : memref<1x10x10x32xbf16, #tpu.memory_space<vmem>>, vector<1x8x8x32xbf16>
    %22 = vector.shape_cast %21 : vector<1x8x8x32xbf16> to vector<64x32xbf16>
    %c64 = arith.constant 64 : index
    %c0_41 = arith.constant 0 : index
    %23 = vector.load %arg2[%c64, %c0_41] : memref<288x128xbf16, #tpu.memory_space<vmem>>, vector<32x128xbf16>
    %cst_42 = arith.constant dense<0.000000e+00> : vector<64x128xf32>
    %24 = tpu.matmul %22, %23, %cst_42 {dimension_numbers = #tpu.dot_dimension_numbers<[1], [0], [0], [1], [0, 0, 1, 1], [], []>} : vector<64x32xbf16>, vector<32x128xbf16>, vector<64x128xf32> -> vector<64x128xf32>
    %25 = arith.addf %20, %24 : vector<64x128xf32>
    %c0_43 = arith.constant 0 : index
    %c1_44 = arith.constant 1 : index
    %c0_45 = arith.constant 0 : index
    %c0_46 = arith.constant 0 : index
    %26 = vector.load %arg7[%c0_43, %c1_44, %c0_45, %c0_46] : memref<1x10x10x32xbf16, #tpu.memory_space<vmem>>, vector<1x8x8x32xbf16>
    %27 = vector.shape_cast %26 : vector<1x8x8x32xbf16> to vector<64x32xbf16>
    %c96 = arith.constant 96 : index
    %c0_47 = arith.constant 0 : index
    %28 = vector.load %arg2[%c96, %c0_47] : memref<288x128xbf16, #tpu.memory_space<vmem>>, vector<32x128xbf16>
    %cst_48 = arith.constant dense<0.000000e+00> : vector<64x128xf32>
    %29 = tpu.matmul %27, %28, %cst_48 {dimension_numbers = #tpu.dot_dimension_numbers<[1], [0], [0], [1], [0, 0, 1, 1], [], []>} : vector<64x32xbf16>, vector<32x128xbf16>, vector<64x128xf32> -> vector<64x128xf32>
    %30 = arith.addf %25, %29 : vector<64x128xf32>
    %c0_49 = arith.constant 0 : index
    %c1_50 = arith.constant 1 : index
    %c1_51 = arith.constant 1 : index
    %c0_52 = arith.constant 0 : index
    %31 = vector.load %arg7[%c0_49, %c1_50, %c1_51, %c0_52] : memref<1x10x10x32xbf16, #tpu.memory_space<vmem>>, vector<1x8x8x32xbf16>
    %32 = vector.shape_cast %31 : vector<1x8x8x32xbf16> to vector<64x32xbf16>
    %c128 = arith.constant 128 : index
    %c0_53 = arith.constant 0 : index
    %33 = vector.load %arg2[%c128, %c0_53] : memref<288x128xbf16, #tpu.memory_space<vmem>>, vector<32x128xbf16>
    %cst_54 = arith.constant dense<0.000000e+00> : vector<64x128xf32>
    %34 = tpu.matmul %32, %33, %cst_54 {dimension_numbers = #tpu.dot_dimension_numbers<[1], [0], [0], [1], [0, 0, 1, 1], [], []>} : vector<64x32xbf16>, vector<32x128xbf16>, vector<64x128xf32> -> vector<64x128xf32>
    %35 = arith.addf %30, %34 : vector<64x128xf32>
    %c0_55 = arith.constant 0 : index
    %c1_56 = arith.constant 1 : index
    %c2_57 = arith.constant 2 : index
    %c0_58 = arith.constant 0 : index
    %36 = vector.load %arg7[%c0_55, %c1_56, %c2_57, %c0_58] : memref<1x10x10x32xbf16, #tpu.memory_space<vmem>>, vector<1x8x8x32xbf16>
    %37 = vector.shape_cast %36 : vector<1x8x8x32xbf16> to vector<64x32xbf16>
    %c160 = arith.constant 160 : index
    %c0_59 = arith.constant 0 : index
    %38 = vector.load %arg2[%c160, %c0_59] : memref<288x128xbf16, #tpu.memory_space<vmem>>, vector<32x128xbf16>
    %cst_60 = arith.constant dense<0.000000e+00> : vector<64x128xf32>
    %39 = tpu.matmul %37, %38, %cst_60 {dimension_numbers = #tpu.dot_dimension_numbers<[1], [0], [0], [1], [0, 0, 1, 1], [], []>} : vector<64x32xbf16>, vector<32x128xbf16>, vector<64x128xf32> -> vector<64x128xf32>
    %40 = arith.addf %35, %39 : vector<64x128xf32>
    %c0_61 = arith.constant 0 : index
    %c2_62 = arith.constant 2 : index
    %c0_63 = arith.constant 0 : index
    %c0_64 = arith.constant 0 : index
    %41 = vector.load %arg7[%c0_61, %c2_62, %c0_63, %c0_64] : memref<1x10x10x32xbf16, #tpu.memory_space<vmem>>, vector<1x8x8x32xbf16>
    %42 = vector.shape_cast %41 : vector<1x8x8x32xbf16> to vector<64x32xbf16>
    %c192 = arith.constant 192 : index
    %c0_65 = arith.constant 0 : index
    %43 = vector.load %arg2[%c192, %c0_65] : memref<288x128xbf16, #tpu.memory_space<vmem>>, vector<32x128xbf16>
    %cst_66 = arith.constant dense<0.000000e+00> : vector<64x128xf32>
    %44 = tpu.matmul %42, %43, %cst_66 {dimension_numbers = #tpu.dot_dimension_numbers<[1], [0], [0], [1], [0, 0, 1, 1], [], []>} : vector<64x32xbf16>, vector<32x128xbf16>, vector<64x128xf32> -> vector<64x128xf32>
    %45 = arith.addf %40, %44 : vector<64x128xf32>
    %c0_67 = arith.constant 0 : index
    %c2_68 = arith.constant 2 : index
    %c1_69 = arith.constant 1 : index
    %c0_70 = arith.constant 0 : index
    %46 = vector.load %arg7[%c0_67, %c2_68, %c1_69, %c0_70] : memref<1x10x10x32xbf16, #tpu.memory_space<vmem>>, vector<1x8x8x32xbf16>
    %47 = vector.shape_cast %46 : vector<1x8x8x32xbf16> to vector<64x32xbf16>
    %c224 = arith.constant 224 : index
    %c0_71 = arith.constant 0 : index
    %48 = vector.load %arg2[%c224, %c0_71] : memref<288x128xbf16, #tpu.memory_space<vmem>>, vector<32x128xbf16>
    %cst_72 = arith.constant dense<0.000000e+00> : vector<64x128xf32>
    %49 = tpu.matmul %47, %48, %cst_72 {dimension_numbers = #tpu.dot_dimension_numbers<[1], [0], [0], [1], [0, 0, 1, 1], [], []>} : vector<64x32xbf16>, vector<32x128xbf16>, vector<64x128xf32> -> vector<64x128xf32>
    %50 = arith.addf %45, %49 : vector<64x128xf32>
    %c0_73 = arith.constant 0 : index
    %c2_74 = arith.constant 2 : index
    %c2_75 = arith.constant 2 : index
    %c0_76 = arith.constant 0 : index
    %51 = vector.load %arg7[%c0_73, %c2_74, %c2_75, %c0_76] : memref<1x10x10x32xbf16, #tpu.memory_space<vmem>>, vector<1x8x8x32xbf16>
    %52 = vector.shape_cast %51 : vector<1x8x8x32xbf16> to vector<64x32xbf16>
    %c256 = arith.constant 256 : index
    %c0_77 = arith.constant 0 : index
    %53 = vector.load %arg2[%c256, %c0_77] : memref<288x128xbf16, #tpu.memory_space<vmem>>, vector<32x128xbf16>
    %cst_78 = arith.constant dense<0.000000e+00> : vector<64x128xf32>
    %54 = tpu.matmul %52, %53, %cst_78 {dimension_numbers = #tpu.dot_dimension_numbers<[1], [0], [0], [1], [0, 0, 1, 1], [], []>} : vector<64x32xbf16>, vector<32x128xbf16>, vector<64x128xf32> -> vector<64x128xf32>
    %55 = arith.addf %50, %54 : vector<64x128xf32>
    %c0_79 = arith.constant 0 : index
    %c0_80 = arith.constant 0 : index
    %56 = vector.load %arg3[%c0_79, %c0_80] : memref<1x128xf32, #tpu.memory_space<vmem>>, vector<1x128xf32>
    %57 = vector.broadcast %56 : vector<1x128xf32> to vector<64x128xf32>
    %58 = arith.addf %55, %57 : vector<64x128xf32>
    %cst_81 = arith.constant 0.000000e+00 : f32
    %59 = vector.broadcast %cst_81 : f32 to vector<64x128xf32>
    %60 = arith.maximumf %58, %59 : vector<64x128xf32>
    %61 = arith.truncf %60 : vector<64x128xf32> to vector<64x128xbf16>
    %c0_82 = arith.constant 0 : index
    %c0_83 = arith.constant 0 : index
    %62 = vector.load %arg4[%c0_82, %c0_83] : memref<128x8xbf16, #tpu.memory_space<vmem>>, vector<128x8xbf16>
    %cst_84 = arith.constant dense<0.000000e+00> : vector<64x8xf32>
    %63 = tpu.matmul %61, %62, %cst_84 {dimension_numbers = #tpu.dot_dimension_numbers<[1], [0], [0], [1], [0, 0, 1, 1], [], []>} : vector<64x128xbf16>, vector<128x8xbf16>, vector<64x8xf32> -> vector<64x8xf32>
    %c0_85 = arith.constant 0 : index
    %c0_86 = arith.constant 0 : index
    %64 = vector.load %arg5[%c0_85, %c0_86] : memref<1x8xf32, #tpu.memory_space<vmem>>, vector<1x8xf32>
    %65 = vector.broadcast %64 : vector<1x8xf32> to vector<64x8xf32>
    %66 = arith.addf %63, %65 : vector<64x8xf32>
    %67 = tpu.iota {dimensions = array<i32: 1>} : vector<64x8xi32>
    %c2_i32 = arith.constant 2 : i32
    %68 = vector.broadcast %c2_i32 : i32 to vector<64x8xi32>
    %69 = arith.cmpi sge, %67, %68 : vector<64x8xi32>
    %c6_i32 = arith.constant 6 : i32
    %70 = vector.broadcast %c6_i32 : i32 to vector<64x8xi32>
    %71 = arith.cmpi slt, %67, %70 : vector<64x8xi32>
    %72 = arith.andi %69, %71 : vector<64x8xi1>
    %73 = arith.negf %66 : vector<64x8xf32>
    %74 = math.exp %73 : vector<64x8xf32>
    %cst_87 = arith.constant 1.000000e+00 : f32
    %75 = vector.broadcast %cst_87 : f32 to vector<64x8xf32>
    %76 = arith.addf %75, %74 : vector<64x8xf32>
    %77 = arith.divf %75, %76 : vector<64x8xf32>
    %78 = arith.select %72, %77, %66 : vector<64x8xi1>, vector<64x8xf32>
    %79 = vector.shape_cast %78 : vector<64x8xf32> to vector<1x64x8xf32>
    %c0_88 = arith.constant 0 : index
    %c0_89 = arith.constant 0 : index
    %c0_90 = arith.constant 0 : index
    %80 = vector.load %arg6[%c0_88, %c0_89, %c0_90] : memref<1x64x8xf32, #tpu.memory_space<vmem>>, vector<1x64x8xf32>
    tpu.vector_store %arg6[%c0_88, %c0_89, %c0_90], %79 {strides = array<i32>} : memref<1x64x8xf32, #tpu.memory_space<vmem>>, vector<1x64x8xf32>,
    return
  }
  func.func @transform_0(%arg0: i32) -> (i32, i32, i32, i32) {
    %c0_i32 = arith.constant 0 : i32
    %c0_i32_0 = arith.constant 0 : i32
    %c0_i32_1 = arith.constant 0 : i32
    %c0_i32_2 = arith.constant 0 : i32
    return %arg0, %c0_i32, %c0_i32_0, %c0_i32_1 : i32, i32, i32, i32
  }
  func.func @transform_1(%arg0: i32) -> (i32, i32) {
    %c0_i32 = arith.constant 0 : i32
    %c0_i32_0 = arith.constant 0 : i32
    %c0_i32_1 = arith.constant 0 : i32
    return %c0_i32, %c0_i32_0 : i32, i32
  }
  func.func @transform_2(%arg0: i32) -> (i32, i32) {
    %c0_i32 = arith.constant 0 : i32
    %c0_i32_0 = arith.constant 0 : i32
    %c0_i32_1 = arith.constant 0 : i32
    return %c0_i32, %c0_i32_0 : i32, i32
  }
  func.func @transform_3(%arg0: i32) -> (i32, i32) {
    %c0_i32 = arith.constant 0 : i32
    %c0_i32_0 = arith.constant 0 : i32
    %c0_i32_1 = arith.constant 0 : i32
    return %c0_i32, %c0_i32_0 : i32, i32
  }
  func.func @transform_4(%arg0: i32) -> (i32, i32) {
    %c0_i32 = arith.constant 0 : i32
    %c0_i32_0 = arith.constant 0 : i32
    %c0_i32_1 = arith.constant 0 : i32
    return %c0_i32, %c0_i32_0 : i32, i32
  }
  func.func @transform_5(%arg0: i32) -> (i32, i32, i32) {
    %c0_i32 = arith.constant 0 : i32
    %c0_i32_0 = arith.constant 0 : i32
    %c0_i32_1 = arith.constant 0 : i32
    return %arg0, %c0_i32, %c0_i32_0 : i32, i32, i32
  }
}

</mosaic_0001>

<bundles_post_ra>
// kernel: tpu_custom_call.1
= control target key start
LH: loop header
LB: loop body
LE: loop exit
PB: predicated region body
PF: predicated region fallthrough
CT: control target
= control target key end

     0   :  { %10 = vsyncpa [#allocation4], 0  ;;  %s2853_s18 = smov 0   ;;  %s3500_s0 = inlined_call_operand.vmem [shape: bf16[2,8,8,32], index: 0, kind: input, shape index: {}]   ;;  %s3501_s1 = inlined_call_operand.hbm [shape: bf16[288,128], index: 1, kind: input, shape index: {}]   ;;  %s3502_s2 = inlined_call_operand.vmem [shape: f32[1,128], index: 2, kind: input, shape index: {}]   ;;  %s3503_s3 = inlined_call_operand.vmem [shape: bf16[128,8], index: 3, kind: input, shape index: {}]   ;;  %s3504_s4 = inlined_call_operand.vmem [shape: f32[1,8], index: 4, kind: input, shape index: {}]   ;;  %s3505_s5 = inlined_call_operand.vmem [shape: f32[2,64,8], index: 5, kind: output, shape index: {}]  }
   0x1 LB: > { %s2859_s19 = sadd.s32 4294967295, %s2817_s18   ;;  %p2343_p0 = scmp.ge.s32.totalorder %s2817_s18, 1  ;;  %s2817_s18 = sphi %s2853_s18, %s16_s18  }
   0x2   : > { %p157_p1 = scmp.lt.s32.totalorder %s2817_s18, 3  ;;  %s2819_s20 = smov [#allocation3]  }
   0x3   : > { %s169_s21 = sshll.u32 %s2819_s20, 4  ;;  %p2698_p3 = scmp.eq.s32.totalorder %s2859_s19, 0  ;;  %s170_s21 = int_to_ptr.vmem [resolvable:$true] %s169_s21 }
   0x4   : > { %p2863_p2 = pnand %p2343_p0, %p157_p1  ;;  %s2792_s23 = scalar_lea.vmem %s170_s21, 2304 }
   0x5   : > { %p2793_p7 = scmp.ne.s32.totalorder %s170_s21, %s2792_s23  ;;  %p2800_p10 = scmp.lt.s32.totalorder %s170_s21, %s170_s21 }
   0x6   : > { %p2694_p4 = pneg %p2863_p2  ;;  %p2801_p11 = scmp.lt.s32.totalorder %s2792_s23, %s2792_s23 }
   0x8   : > { %p2695_p5 = pnand %p2698_p3, %p2694_p4  ;;  %p2802_p12 = por %p2801_p11, %p2800_p10 }
   0xa   : > { %p2783_p6 = pneg %p2695_p5 }
   0xc   : > { %p2795_p8 = pnand %p2793_p7, %p2783_p6 }
   0xe   : > { %p2796_p9 = pneg %p2795_p8 }
  0x10   : > { %p2803_p13 = pnand %p2802_p12, %p2796_p9 }
  0x12   : > { %2806 = shalt.err (!%p2803_p13)
}
  0x13   : > { %s2820_s24 = smov 64   ;;  %s2821_s25 = smov 4  }
  0x14   : > { %2697 = dma.hbm_to_vmem [thread:$0]  (!%p2695_p5), %s3501_s1, 2304, %s170_s21, [#allocation4], %s2820_s24, %s2820_s24, %s2821_s25  }
  0x15   : > { %202 = sbr.rel (%p2863_p2) target bundleno = 610 (0x262), region = 40 }
  0x1a   : > { %2812 = dma.done.wait (%p2698_p3), [#allocation4], 2304  }
  0x1b   : > { %2814 = vsyncadd (%p2698_p3), [#allocation4], 4294964992  ;;  %p230_p0 = scmp.lt.s32.totalorder %s2859_s19, 1  ;;  %vm241_vm0 = vcmask 257024   ;;  %vm243_vm1 = vcmask 253952   ;;  %v2822_v0 = vmov 0  }
  0x1c   : > { %242 = vst.msk [vmem:[#allocation2] sm:$0xf] %vm241_vm0, %v2822_v0  ;;  %246 = vst.msk [vmem:[#allocation2 + $0x48] sm:$0xf] %vm241_vm0, %v2822_v0  ;;  %vm250_vm2 = vsmask.f32 256 }
  0x1d   : > { %244 = vst.msk [vmem:[#allocation2 + $0x4] sm:$0x1] %vm243_vm1, %v2822_v0  ;;  %247 = vst.msk [vmem:[#allocation2 + $0x4c] sm:$0x1] %vm243_vm1, %v2822_v0  ;;  %s3528_s19 = smov (!%p230_p0, %s2859_s19), 1  ;;  %v2712_v3 = vld [vmem:[#allocation3 + $0x18] sm:$0xff]  }
  0x1e   : > { %vm276_vm3 = vsmask.f32 7938  ;;  %s2486_s28 = sshll.u32 %s3528_s19, 5  ;;  %vm2888_vm4 = vmand %vm243_vm1, %vm250_vm2  ;;  %v2713_v4 = vld [vmem:[#allocation3 + $0x10] sm:$0xff]   ;;  %2554 = vmatprep.subr.bf16.mxu0 %v2712_v3  ;;  %v252_v5 = vld [vmem:[#allocation2 + $0x8] sm:$0x1] }
  0x1f   : > { %s2895_s6 = scalar_lea.vmem %s3500_s0, %s2486_s28  ;;  %vm2898_vm5 = vmand %vm243_vm1, %vm276_vm3  ;;  %v278_v6 = vld [vmem:[#allocation2 + $0xc] sm:$0x1]  ;;  %2555 = vmatpush3.bf16.msra.mxu0 %v2712_v3  ;;  %v253_v8 = vsel %vm2888_vm4, 0, %v252_v5  ;;  %v2911_v15 = vld [vmem:[#allocation3 + $0x8] sm:$0xff]   ;;  %vm460_vm7 = vsmask.f32 3328 }
  0x20   : > { %v302_v7 = vld [vmem:[%s2895_s6] sm:$0xf]  ;;  %v279_v9 = vsel %vm2898_vm5, 0, %v278_v6  ;;  %2556 = vmatprep.subr.bf16.mxu0 %v2713_v4  ;;  %254 = vst [vmem:[#allocation2 + $0x8] sm:$0x1] %v253_v8  ;;  %2686 = vmatprep.subr.bf16.mxu1 %v2911_v15  ;;  %v2918_v23 = vld [vmem:[#allocation3] sm:$0xff]   ;;  %vm2929_vm6 = vmand %vm241_vm0, %vm276_vm3 }
  0x21   : > { %v311_v10 = vshrl.u32 %v302_v7, 16  ;;  %280 = vst [vmem:[#allocation2 + $0xc] sm:$0x1] %v279_v9  ;;  %v314_v12 = vshll.u32 %v302_v7, 16  ;;  %v255_v17 = vld [vmem:[#allocation2 + $0x10] sm:$0x1]  ;;  %2688 = vmatpush3.bf16.msra.mxu1 %v2911_v15 }
  0x22   : > { %v258_v18 = vld [vmem:[#allocation2 + $0x18] sm:$0x1]  ;;  %v256_v21 = vsel %vm2888_vm4, 0, %v255_v17  ;;  %v281_v22 = vld [vmem:[#allocation2 + $0x14] sm:$0x1]  ;;  %2687 = vmatprep.subr.bf16.mxu1 %v2918_v23  ;;  %v2938_v37 = vld [vmem:[#allocation3 + $0x38] sm:$0xff]  }
  0x23   : > { %v2907_v11 = vld [vmem:[#allocation2] sm:$0xf]  ;;  %v313_v13 = vrot.slane %v311_v10, 7  ;;  %2557 = vmatpush3.bf16.msra.mxu0 %v2713_v4  ;;  %257 = vst [vmem:[#allocation2 + $0x10] sm:$0x1] %v256_v21  ;;  %v259_v25 = vsel %vm2888_vm4, 0, %v258_v18 }
  0x24   : > { %v2909_v14 = vld [vmem:[#allocation2 + $0x4] sm:$0x1]  ;;  %v464_v16 = vshrl.u32 %v2907_v11, 16  ;;  %v467_v20 = vshll.u32 %v2907_v11, 16  ;;  %2566 = vmatprep.subr.bf16.mxu0 %v2911_v15  ;;  %v282_v26 = vsel %vm2898_vm5, 0, %v281_v22  ;;  %vm603_vm10 = vcmask 261120  }
  0x25   : > { %v317_v19 = vrot.slane %v313_v13, 4  ;;  %v316_v24 = vor.u32 %v314_v12, %v313_v13  ;;  %v284_v27 = vld [vmem:[#allocation2 + $0x1c] sm:$0x1]  ;;  %v303_v28 = vld [vmem:[%s2895_s6 + $0x4] sm:$0xf]  ;;  %v473_v34 = vshll.u32 %v2909_v14, 16  ;;  %2689 = vmatpush3.bf16.msra.mxu1 %v2918_v23 }
  0x26   : > { %260 = vst [vmem:[#allocation2 + $0x18] sm:$0x1] %v259_v25  ;;  %283 = vst [vmem:[#allocation2 + $0x14] sm:$0x1] %v282_v26  ;;  %v285_v30 = vsel %vm2898_vm5, 0, %v284_v27  ;;  %v319_v32 = vshrl.u32 %v303_v28, 16  ;;  %2590 = vmatprep.subr.bf16.mxu1 %v2938_v37 }
  0x27   : > { %v304_v31 = vld [vmem:[%s2895_s6 + $0x8] sm:$0xf]  ;;  %v322_v33 = vshll.u32 %v303_v28, 16  ;;  %286 = vst [vmem:[#allocation2 + $0x1c] sm:$0x1] %v285_v30  ;;  %v466_v40 = vrot.slane %v464_v16, 4 }
  0x28   : > { %v327_v35 = vshrl.u32 %v304_v31, 16  ;;  %v330_v36 = vshll.u32 %v304_v31, 16  ;;  %v392_v38 = vld [vmem:[#allocation2 + $0x8] sm:$0xf]  ;;  %v395_v39 = vld [vmem:[#allocation2 + $0xc] sm:$0x1] }
  0x29   : > { %v321_v41 = vrot.slane %v319_v32, 7  ;;  %v393_v42 = vsel %vm2929_vm6, %v316_v24, %v392_v38  ;;  %v396_v43 = vsel %vm2888_vm4, %v317_v19, %v395_v39  ;;  %vm461_vm8 = vsmask.f32 7440  ;;  %v261_v46 = vld [vmem:[#allocation2 + $0x20] sm:$0x1]  ;;  %s2487_s29 = sshll.u32 %s3528_s19, 6 }
  0x2a   : > { %v469_v44 = vrot.slane %v467_v20, 5  ;;  %v329_v45 = vrot.slane %v327_v35, 7  ;;  %394 = vst [vmem:[#allocation2 + $0x8] sm:$0xf] %v393_v42  ;;  %397 = vst [vmem:[#allocation2 + $0xc] sm:$0x1] %v396_v43  ;;  %s239_s7 = scalar_lea.vmem %s3505_s5, %s2487_s29 }
  0x2b   : > { %v324_v47 = vor.u32 %v322_v33, %v321_v41  ;;  %v325_v48 = vrot.slane %v321_v41, 4  ;;  %v262_v49 = vsel %vm2888_vm4, 0, %v261_v46  ;;  %v264_v50 = vld [vmem:[#allocation2 + $0x28] sm:$0x1]  ;;  %v287_v51 = vld [vmem:[#allocation2 + $0x24] sm:$0x1]  ;;  %vm2981_vm9 = vmor %vm460_vm7, %vm461_vm8 }
  0x2c   : > { %v332_v52 = vor.u32 %v330_v36, %v329_v45  ;;  %v333_v53 = vrot.slane %v329_v45, 4  ;;  %263 = vst [vmem:[#allocation2 + $0x20] sm:$0x1] %v262_v49  ;;  %v265_v54 = vsel %vm2888_vm4, 0, %v264_v50  ;;  %v288_v55 = vsel %vm2898_vm5, 0, %v287_v51 }
  0x2d   : > { %v290_v56 = vld [vmem:[#allocation2 + $0x2c] sm:$0x1]  ;;  %v2952_v57 = vrot.slane %v473_v34, 5  ;;  %v398_v58 = vld [vmem:[#allocation2 + $0x10] sm:$0xf]  ;;  %v470_v61 = vor.u32 %v469_v44, %v466_v40  ;;  %vm814_vm11 = vcmask 1042432  }
  0x2e   : > { %266 = vst [vmem:[#allocation2 + $0x28] sm:$0x1] %v265_v54  ;;  %289 = vst [vmem:[#allocation2 + $0x24] sm:$0x1] %v288_v55  ;;  %v291_v59 = vsel %vm2898_vm5, 0, %v290_v56  ;;  %v399_v62 = vsel %vm2929_vm6, %v324_v47, %v398_v58  ;;  %vm815_vm12 = vcmask 1046532  }
  0x2f   : > { %v305_v60 = vld [vmem:[%s2895_s6 + $0xc] sm:$0xf]  ;;  %v401_v63 = vld [vmem:[#allocation2 + $0x14] sm:$0x1]  ;;  %v404_v0 = vld [vmem:[#allocation2 + $0x18] sm:$0xf] }
  0x30   : > { %292 = vst [vmem:[#allocation2 + $0x2c] sm:$0x1] %v291_v59  ;;  %v306_v3 = vld [vmem:[%s2895_s6 + $0x10] sm:$0xf]  ;;  %400 = vst [vmem:[#allocation2 + $0x10] sm:$0xf] %v399_v62  ;;  %v402_v4 = vsel %vm2888_vm4, %v325_v48, %v401_v63  ;;  %v405_v5 = vsel %vm2929_vm6, %v332_v52, %v404_v0 }
  0x31   : > { %v407_v6 = vld [vmem:[#allocation2 + $0x1c] sm:$0x1]  ;;  %v335_v7 = vshrl.u32 %v305_v60, 16  ;;  %v338_v8 = vshll.u32 %v305_v60, 16  ;;  %v267_v9 = vld [vmem:[#allocation2 + $0x30] sm:$0x1]  ;;  %vm3058_vm13 = vmor %vm814_vm11, %vm815_vm12 }
  0x32   : > { %403 = vst [vmem:[#allocation2 + $0x14] sm:$0x1] %v402_v4  ;;  %406 = vst [vmem:[#allocation2 + $0x18] sm:$0xf] %v405_v5  ;;  %v408_v10 = vsel %vm2888_vm4, %v333_v53, %v407_v6  ;;  %v343_v12 = vshrl.u32 %v306_v3, 16  ;;  %v346_v13 = vshll.u32 %v306_v3, 16 }
  0x33   : > { %v268_v16 = vsel %vm2888_vm4, 0, %v267_v9  ;;  %v270_v17 = vld [vmem:[#allocation2 + $0x38] sm:$0x1]  ;;  %409 = vst [vmem:[#allocation2 + $0x1c] sm:$0x1] %v408_v10  ;;  %v337_v18 = vrot.slane %v335_v7, 7 }
  0x34   : > { %269 = vst [vmem:[#allocation2 + $0x30] sm:$0x1] %v268_v16  ;;  %v271_v19 = vsel %vm2888_vm4, 0, %v270_v17  ;;  %v293_v20 = vld [vmem:[#allocation2 + $0x34] sm:$0x1]  ;;  %v345_v25 = vrot.slane %v343_v12, 7 }
  0x35   : > { %v296_v21 = vld [vmem:[#allocation2 + $0x3c] sm:$0x1]  ;;  %v2970_v22 = vld [vmem:[#allocation2 + $0x8] sm:$0xf]  ;;  %v2972_v24 = vld [vmem:[#allocation2 + $0xc] sm:$0x1]  ;;  %v340_v33 = vor.u32 %v338_v8, %v337_v18 }
  0x36   : > { %272 = vst [vmem:[#allocation2 + $0x38] sm:$0x1] %v271_v19  ;;  %v294_v26 = vsel %vm2898_vm5, 0, %v293_v20  ;;  %v471_v27 = vrot.slane %v470_v61, 4  ;;  %v478_v28 = vshrl.u32 %v2970_v22, 16  ;;  %v481_v30 = vshll.u32 %v2970_v22, 16 }
  0x37   : > { %v487_v31 = vshll.u32 %v2972_v24, 16  ;;  %v410_v32 = vld [vmem:[#allocation2 + $0x20] sm:$0xf]  ;;  %295 = vst [vmem:[#allocation2 + $0x34] sm:$0x1] %v294_v26  ;;  %v341_v34 = vrot.slane %v337_v18, 4  ;;  %v348_v35 = vor.u32 %v346_v13, %v345_v25 }
  0x38   : > { %v349_v36 = vrot.slane %v345_v25, 4  ;;  %v413_v38 = vld [vmem:[#allocation2 + $0x24] sm:$0x1]  ;;  %v416_v39 = vld [vmem:[#allocation2 + $0x28] sm:$0xf]  ;;  %v480_v41 = vrot.slane %v478_v28, 4  ;;  %v411_v47 = vsel %vm2929_vm6, %v340_v33, %v410_v32  ;;  %v476_v58 = vsel %vm2981_vm9, %v471_v27, %v2952_v57 }
  0x39   : > { %v483_v42 = vrot.slane %v481_v30, 5  ;;  %v489_v43 = vrot.slane %v487_v31, 5  ;;  %v419_v44 = vld [vmem:[#allocation2 + $0x2c] sm:$0x1]  ;;  %v297_v45 = vsel %vm2898_vm5, 0, %v296_v21  ;;  %v414_v48 = vsel %vm2888_vm4, %v341_v34, %v413_v38 }
  0x3a   : > { %v2987_v46 = vld [vmem:[#allocation2 + $0x10] sm:$0xf]  ;;  %v417_v49 = vsel %vm2929_vm6, %v348_v35, %v416_v39  ;;  %v420_v50 = vsel %vm2888_vm4, %v349_v36, %v419_v44  ;;  %298 = vst [vmem:[#allocation2 + $0x3c] sm:$0x1] %v297_v45  ;;  %v2998_v51 = vld [vmem:[%s2895_s6 + $0x14] sm:$0xf] }
  0x3b   : > { %v484_v52 = vor.u32 %v483_v42, %v480_v41  ;;  %v3000_v53 = vld [vmem:[#allocation2 + $0x18] sm:$0xf]  ;;  %v3002_v54 = vld [vmem:[#allocation2 + $0x14] sm:$0x1]  ;;  %v492_v55 = vshrl.u32 %v2987_v46, 16  ;;  %v495_v56 = vshll.u32 %v2987_v46, 16 }
  0x3c   : > { %412 = vst [vmem:[#allocation2 + $0x20] sm:$0xf] %v411_v47  ;;  %415 = vst [vmem:[#allocation2 + $0x24] sm:$0x1] %v414_v48  ;;  %v3009_v59 = vld [vmem:[#allocation2 + $0x1c] sm:$0x1] }
  0x3d   : > { %418 = vst [vmem:[#allocation2 + $0x28] sm:$0xf] %v417_v49  ;;  %421 = vst [vmem:[#allocation2 + $0x2c] sm:$0x1] %v420_v50  ;;  %v501_v60 = vshll.u32 %v3002_v54, 16  ;;  %v506_v61 = vshrl.u32 %v3000_v53, 16 }
  0x3e   : > { %v509_v62 = vshll.u32 %v3000_v53, 16  ;;  %v485_v63 = vrot.slane %v484_v52, 4  ;;  %v494_v0 = vrot.slane %v492_v55, 4  ;;  %v497_v3 = vrot.slane %v495_v56, 5  ;;  %v308_v5 = vld [vmem:[%s2895_s6 + $0x18] sm:$0xf] }
  0x3f   : > { %v515_v4 = vshll.u32 %v3009_v59, 16  ;;  %v819_v6 = vrot.slane %v2909_v14, 5  ;;  %v508_v7 = vrot.slane %v506_v61, 4  ;;  %v503_v10 = vrot.slane %v501_v60, 5  ;;  %v422_v38 = vld [vmem:[#allocation2 + $0x30] sm:$0xf] }
  0x40   : > { %v511_v8 = vrot.slane %v509_v62, 5  ;;  %v490_v57 = vsel %vm2981_vm9, %v485_v63, %v489_v43  ;;  %v498_v9 = vor.u32 %v497_v3, %v494_v0  ;;  %v351_v12 = vshrl.u32 %v2998_v51, 16  ;;  %v425_v44 = vld [vmem:[#allocation2 + $0x34] sm:$0x1]  ;;  %v428_v45 = vld [vmem:[#allocation2 + $0x38] sm:$0xf] }
  0x41   : > { %v2352_v13 = vcombine.low %v476_v58, %v490_v57  ;;  %v517_v17 = vrot.slane %v515_v4, 5  ;;  %v359_v18 = vshrl.u32 %v308_v5, 16  ;;  %v354_v21 = vshll.u32 %v2998_v51, 16  ;;  %v431_v56 = vld [vmem:[#allocation2 + $0x3c] sm:$0x1] }
  0x42   : > { %v512_v16 = vor.u32 %v511_v8, %v508_v7  ;;  %v499_v19 = vrot.slane %v498_v9, 4  ;;  %v353_v20 = vrot.slane %v351_v12, 7  ;;  %v362_v25 = vshll.u32 %v308_v5, 16  ;;  %v790_v5 = vld [vmem:[#allocation2] sm:$0xe]  ;;  %v3042_v9 = vld [vmem:[#allocation3 + $0x28] sm:$0xff]  }
  0x43   : > { %2558 = vmatprep.mubr.msk.bf16.mxu0 %vm603_vm10, %v2352_v13  ;;  %v444_v27 = vld [vmem:[#allocation2 + $0x20] sm:$0xf]  ;;  %v361_v30 = vrot.slane %v359_v18, 7  ;;  %v3024_v32 = vld [vmem:[#allocation2 + $0x24] sm:$0x1]  ;;  %vm2265_vm1 = vcmask 64512  }
  0x44   : > { %v513_v26 = vrot.slane %v512_v16, 4  ;;  %v445_v28 = vld [vmem:[#allocation2 + $0x28] sm:$0xf]  ;;  %v504_v31 = vsel %vm2981_vm9, %v499_v19, %v503_v10  ;;  %v3026_v33 = vld [vmem:[#allocation2 + $0x2c] sm:$0x1]  ;;  %v520_v34 = vshrl.u32 %v444_v27, 16  ;;  %v356_v55 = vor.u32 %v354_v21, %v353_v20 }
  0x45   : > { %v523_v35 = vshll.u32 %v444_v27, 16  ;;  %v2364_v36 = vcombine.low %v444_v27, %v445_v28  ;;  %v529_v41 = vshll.u32 %v3024_v32, 16  ;;  %v534_v42 = vshrl.u32 %v445_v28, 16  ;;  %v791_v13 = vld [vmem:[#allocation2 + $0x8] sm:$0xe] }
  0x46   : > { %v518_v39 = vsel %vm2981_vm9, %v513_v26, %v517_v17  ;;  %v537_v43 = vshll.u32 %v445_v28, 16  ;;  %v522_v48 = vrot.slane %v520_v34, 4  ;;  %v543_v50 = vshll.u32 %v3026_v33, 16  ;;  %v792_v16 = vld [vmem:[#allocation2 + $0x10] sm:$0xe]  ;;  %v2743_v28 = vld [vmem:[%s3503_s3 + $0x28] sm:$0xff]  }
  0x47   : > { %v2353_v47 = vcombine.low %v504_v31, %v518_v39  ;;  %v525_v49 = vrot.slane %v523_v35, 5  ;;  %2574 = vmatprep.mubr.msk.bf16.mxu1 %vm603_vm10, %v2364_v36  ;;  %v536_v51 = vrot.slane %v534_v42, 4  ;;  %v531_v60 = vrot.slane %v529_v41, 5  ;;  %v793_v18 = vld [vmem:[#allocation2 + $0x18] sm:$0xe] }
  0x48   : > { %v539_v52 = vrot.slane %v537_v43, 5  ;;  %v357_v61 = vrot.slane %v353_v20, 4  ;;  %v364_v62 = vor.u32 %v362_v25, %v361_v30  ;;  %v545_v0 = vrot.slane %v543_v50, 5  ;;  %v3065_v31 = vld [vmem:[#allocation2 + $0x28] sm:$0xe] }
  0x49   : > { %2559 = vmatmul.mubr.msk.bf16.vlgmr.msra.gmra.mxu0 %vm603_vm10, %v2353_v47  ;;  %v526_v58 = vor.u32 %v525_v49, %v522_v48  ;;  %v365_v3 = vrot.slane %v361_v30, 4  ;;  %v423_v4 = vsel %vm2929_vm6, %v356_v55, %v422_v38  ;;  %v827_v19 = vrot.slane %v3002_v54, 5  ;;  %v3062_v30 = vld [vmem:[#allocation2 + $0x20] sm:$0xe]  ;;  %v273_v14 = vld [vmem:[#allocation2 + $0x40] sm:$0x1] }
  0x4a   : > { %2567 = vmatpush3.bf16.msra.mxu0 %v2911_v15  ;;  %v540_v63 = vor.u32 %v539_v52, %v536_v51  ;;  %424 = vst [vmem:[#allocation2 + $0x30] sm:$0xf] %v423_v4  ;;  %v426_v8 = vsel %vm2888_vm4, %v357_v61, %v425_v44  ;;  %v429_v57 = vsel %vm2929_vm6, %v364_v62, %v428_v45  ;;  %v823_v15 = vrot.slane %v2972_v24, 5  ;;  %v2722_v49 = vld [vmem:[#allocation3 + $0x30] sm:$0xff]   ;;  %v309_v4 = vld [vmem:[%s2895_s6 + $0x1c] sm:$0xf] }
  0x4b   : > { %v527_v7 = vrot.slane %v526_v58, 4  ;;  %2568 = vmatprep.subr.bf16.mxu0 %v2918_v23  ;;  %427 = vst [vmem:[#allocation2 + $0x34] sm:$0x1] %v426_v8  ;;  %430 = vst [vmem:[#allocation2 + $0x38] sm:$0xf] %v429_v57  ;;  %v432_v12 = vsel %vm2888_vm4, %v365_v3, %v431_v56  ;;  %v831_v20 = vrot.slane %v3009_v59, 5 }
  0x4c   : > { %v541_v10 = vrot.slane %v540_v63, 4  ;;  %433 = vst [vmem:[#allocation2 + $0x3c] sm:$0x1] %v432_v12  ;;  %v2372_v25 = vrot.slane %v790_v5, 9  ;;  %v2373_v26 = vrot.slane %v791_v13, 9  ;;  %v835_v27 = vrot.slane %v3024_v32, 5 }
  0x4d   : > { %v532_v17 = vsel %vm2981_vm9, %v527_v7, %v531_v60  ;;  %v2374_v54 = vrot.slane %v792_v16, 9  ;;  %v2375_v59 = vrot.slane %v793_v18, 9  ;;  %v2376_v55 = vrot.slane %v3062_v30, 9  ;;  %v2729_v5 = vld [vmem:[#allocation3 + $0x58] sm:$0xff]   ;;  %v3284_v1 = vld [vmem:[#allocation2 + $0x1c] sm:$0x1] }
  0x4e   : > { %v546_v24 = vsel %vm2981_vm9, %v541_v10, %v545_v0  ;;  %2569 = vmatpush3.bf16.msra.mxu0 %v2918_v23  ;;  %v2724_v23 = vld [vmem:[#allocation2 + $0x8] ss:$8 sps:$4 sm:$0xff]   ;;  %v3075_v42 = vsel %vm3058_vm13, %v2372_v25, %v819_v6  ;;  %v2377_v6 = vrot.slane %v3065_v31, 9  ;;  %v839_v60 = vrot.slane %v3026_v33, 5  ;;  %v2725_v33 = vld [vmem:[#allocation2 + $0x18] ss:$8 sps:$4 sm:$0xff]  }
  0x4f   : > { %v2354_v21 = vcombine.low %v532_v17, %v546_v24  ;;  %2578 = vmatprep.subr.bf16.mxu0 %v3042_v9  ;;  %v3093_v8 = vsel %vm3058_vm13, %v2373_v26, %v823_v15  ;;  %v274_v57 = vsel %vm2888_vm4, 0, %v273_v14  ;;  %v367_v10 = vshrl.u32 %v309_v4, 16  ;;  %v1091_v25 = vld [vmem:[#allocation2 + $0x8] sm:$0xf] }
  0x50   : > { %v3103_v13 = vsel %vm3058_vm13, %v2375_v59, %v831_v20  ;;  %275 = vst [vmem:[#allocation2 + $0x40] sm:$0x1] %v274_v57  ;;  %v370_v17 = vshll.u32 %v309_v4, 16  ;;  %v2362_v15 = vcombine.low %v2907_v11, %v2970_v22  ;;  %v2363_v24 = vcombine.low %v2987_v46, %v3000_v53  ;;  %v2730_v59 = vld [vmem:[#allocation3 + $0x50] sm:$0xff]   ;;  %v1093_v11 = vld [vmem:[#allocation2 + $0x10] sm:$0xf] }
  0x51   : > { %2562 = vmatprep.mubr.msk.bf16.mxu0 %vm603_vm10, %v2354_v21  ;;  %v446_v34 = vld [vmem:[#allocation2 + $0x30] sm:$0xf]  ;;  %v3109_v21 = vrot.slane %v367_v10, 7  ;;  %v2380_v20 = vcombine.low %v3075_v42, %v3093_v8  ;;  %v3150_v57 = vld [vmem:[#allocation2 + $0x24] sm:$0x1]  ;;  %v3154_v31 = vld [vmem:[#allocation3 + $0x78] sm:$0xff]  }
  0x52   : > { %v3067_v35 = vld [vmem:[#allocation2 + $0x30] sm:$0xe]  ;;  %v447_v36 = vld [vmem:[#allocation2 + $0x38] sm:$0xf]  ;;  %v3069_v38 = vld [vmem:[#allocation2 + $0x34] sm:$0x1] }
  0x53   : > { %v548_v39 = vshrl.u32 %v446_v34, 16  ;;  %v551_v41 = vshll.u32 %v446_v34, 16  ;;  %v3077_v43 = vld [vmem:[#allocation2 + $0x3c] sm:$0x1]  ;;  %v557_v44 = vshll.u32 %v3069_v38, 16  ;;  %v562_v45 = vshrl.u32 %v447_v36, 16 }
  0x54   : > { %v565_v47 = vshll.u32 %v447_v36, 16  ;;  %v2365_v48 = vcombine.low %v446_v34, %v447_v36  ;;  %v571_v52 = vshll.u32 %v3077_v43, 16  ;;  %v3085_v61 = vld [vmem:[#allocation2 + $0x38] sm:$0xe]  ;;  %v2378_v3 = vrot.slane %v3067_v35, 9 }
  0x55   : > { %v550_v50 = vrot.slane %v548_v39, 4  ;;  %v553_v51 = vrot.slane %v551_v41, 5  ;;  %v564_v56 = vrot.slane %v562_v45, 4  ;;  %v559_v63 = vrot.slane %v557_v44, 5  ;;  %v2727_v16 = vld [vmem:[#allocation2 + $0x28] ss:$8 sps:$4 sm:$0xff]  }
  0x56   : > { %v567_v58 = vrot.slane %v565_v47, 5  ;;  %2575 = vmatmul.mubr.msk.bf16.vlgmr.msra.gmra.mxu1 %vm603_vm10, %v2365_v48  ;;  %v573_v0 = vrot.slane %v571_v52, 5  ;;  %v843_v26 = vrot.slane %v3069_v38, 5  ;;  %v847_v36 = vrot.slane %v3077_v43, 5  ;;  %v3125_v38 = vld [vmem:[#allocation2 + $0x14] sm:$0x1] }
  0x57   : > { %v554_v62 = vor.u32 %v553_v51, %v550_v50  ;;  %2591 = vmatpush3.bf16.msra.mxu1 %v2938_v37  ;;  %2594 = vmatprep.mubr.msk.bf16.mxu1 %vm603_vm10, %v2724_v23  ;;  %v3099_v37 = vsel %vm3058_vm13, %v2374_v54, %v827_v19  ;;  %v2379_v54 = vrot.slane %v3085_v61, 9  ;;  %v3117_v23 = vld [vmem:[#allocation2 + $0xc] sm:$0x1]  ;;  %v1108_v39 = vshrl.u32 %v1091_v25, 16  ;;  %v1095_v48 = vld [vmem:[#allocation2 + $0x18] sm:$0xf] }
  0x58   : > { %v568_v7 = vor.u32 %v567_v58, %v564_v56  ;;  %2592 = vmatprep.subr.bf16.mxu1 %v2722_v49  ;;  %v2381_v34 = vcombine.low %v3099_v37, %v3103_v13  ;;  %v372_v44 = vor.u32 %v370_v17, %v3109_v21  ;;  %v1111_v45 = vshll.u32 %v1091_v25, 16  ;;  %v3129_v52 = vld [vmem:[#allocation2 + $0x1c] sm:$0x1]  ;;  %v1097_v61 = vld [vmem:[#allocation2 + $0x20] sm:$0xf] }
  0x59   : > { %v555_v12 = vrot.slane %v554_v62, 4  ;;  %v1122_v47 = vshrl.u32 %v1093_v11, 16  ;;  %v1110_v50 = vrot.slane %v1108_v39, 4  ;;  %v1125_v51 = vshll.u32 %v1093_v11, 16  ;;  %v434_v4 = vld [vmem:[#allocation2 + $0x40] sm:$0xf] }
  0x5a   : > { %v569_v18 = vrot.slane %v568_v7, 4  ;;  %v1136_v14 = vshrl.u32 %v1095_v48, 16  ;;  %v1113_v43 = vrot.slane %v1111_v45, 5  ;;  %v1117_v56 = vshll.u32 %v3117_v23, 16  ;;  %v1332_v10 = vld [vmem:[#allocation2 + $0x8] sm:$0xe] }
  0x5b   : > { %v560_v19 = vsel %vm2981_vm9, %v555_v12, %v559_v63  ;;  %2593 = vmatpush3.bf16.msra.mxu1 %v2722_v49  ;;  %v373_v49 = vrot.slane %v3109_v21, 4  ;;  %v1124_v58 = vrot.slane %v1122_v47, 4  ;;  %v1139_v62 = vshll.u32 %v1095_v48, 16 }
  0x5c   : > { %v574_v22 = vsel %vm2981_vm9, %v569_v18, %v573_v0  ;;  %2614 = vmatprep.subr.bf16.mxu1 %v2729_v5  ;;  %v3141_v63 = vsel %vm3058_vm13, %v2376_v55, %v835_v27  ;;  %v3147_v0 = vsel %vm3058_vm13, %v2377_v6, %v839_v60  ;;  %v1127_v7 = vrot.slane %v1125_v51, 5  ;;  %v1099_v51 = vld [vmem:[#allocation2 + $0x28] sm:$0xf] }
  0x5d   : > { %v2355_v41 = vcombine.low %v560_v19, %v574_v22  ;;  %v435_v32 = vsel %vm2929_vm6, %v372_v44, %v434_v4  ;;  %v1114_v30 = vor.u32 %v1113_v43, %v1110_v50  ;;  %v1138_v27 = vrot.slane %v1136_v14, 4  ;;  %v1335_v50 = vld [vmem:[#allocation2 + $0x20] sm:$0xe] }
  0x5e   : > { %2595 = vmatmul.mubr.msk.bf16.vlgmr.msra.gmra.mxu1 %vm603_vm10, %v2725_v33  ;;  %v1131_v33 = vshll.u32 %v3125_v38, 16  ;;  %v1141_v55 = vrot.slane %v1139_v62, 5  ;;  %436 = vst [vmem:[#allocation2 + $0x40] sm:$0xf] %v435_v32  ;;  %v1128_v6 = vor.u32 %v1127_v7, %v1124_v58  ;;  %v1145_v60 = vshll.u32 %v3129_v52, 16  ;;  %v2726_v32 = vld [vmem:[#allocation3 + $0x40] sm:$0xff]  }
  0x5f   : > { %2563 = vmatmul.mubr.msk.bf16.gmra.mxu0 %vm603_vm10, %v2355_v41  ;;  %2598 = vmatprep.mubr.msk.bf16.mxu1 %vm603_vm10, %v2727_v16  ;;  %v1153_v12 = vshll.u32 %v1097_v61, 16  ;;  %v2721_v16 = vld [vmem:[#allocation3 + $0x20] sm:$0xff]   ;;  %v3157_v17 = vrot.slane %v1117_v56, 5  ;;  %v1159_v29 = vshll.u32 %v3150_v57, 16  ;;  %v2410_v25 = vrot.slane %v1332_v10, 9 }
  0x60   : > { %2570 = vmatprep.mubr.msk.bf16.mxu0 %vm603_vm10, %v2362_v15  ;;  %2615 = vmatpush3.bf16.msra.mxu1 %v2729_v5  ;;  %v1150_v5 = vshrl.u32 %v1097_v61, 16  ;;  %v1142_v18 = vor.u32 %v1141_v55, %v1138_v27  ;;  %v1333_v15 = vld [vmem:[#allocation2 + $0x10] sm:$0xe]  ;;  %v3160_v19 = vrot.slane %v1114_v30, 4  ;;  %v3162_v11 = vrot.slane %v1131_v33, 5 }
  0x61   : > { %2616 = vmatprep.subr.bf16.mxu1 %v2730_v59  ;;  %v1155_v39 = vrot.slane %v1153_v12, 5  ;;  %v1334_v41 = vld [vmem:[#allocation2 + $0x18] sm:$0xe]  ;;  %v3168_v44 = vsel %vm3058_vm13, %v2378_v3, %v843_v26  ;;  %v3172_v45 = vsel %vm3058_vm13, %v2379_v54, %v847_v36  ;;  %v3174_v47 = vrot.slane %v1128_v6, 4  ;;  %v3183_v26 = vld [vmem:[#allocation2 + $0x2c] sm:$0x1] }
  0x62   : > { %v1152_v22 = vrot.slane %v1150_v5, 4  ;;  %v1358_v48 = vrot.slane %v3117_v23, 5  ;;  %v3180_v14 = vrot.slane %v1145_v60, 5  ;;  %v2411_v35 = vrot.slane %v1333_v15, 9  ;;  %v2723_v54 = vld [vmem:[#allocation3 + $0x48] sm:$0xff]  }
  0x63   : > { %v1362_v3 = vrot.slane %v3125_v38, 5  ;;  %v3189_v36 = vrot.slane %v1159_v29, 5  ;;  %v2412_v56 = vrot.slane %v1334_v41, 9  ;;  %v2382_v46 = vcombine.low %v3141_v63, %v3147_v0  ;;  %v1101_v58 = vld [vmem:[#allocation2 + $0x30] sm:$0xf] }
  0x64   : > { %2617 = vmatpush3.bf16.msra.mxu1 %v2730_v59  ;;  %v3178_v59 = vrot.slane %v1142_v18, 4  ;;  %v1156_v23 = vor.u32 %v1155_v39, %v1152_v22  ;;  %v1359_v43 = vsel %vm3058_vm13, %v2410_v25, %v1358_v48  ;;  %v2413_v38 = vrot.slane %v1335_v50, 9  ;;  %v3203_v61 = vld [vmem:[#allocation2 + $0x34] sm:$0x1]  ;;  %v299_v7 = vld [vmem:[#allocation2 + $0x44] sm:$0x1] }
  0x65   : > { %2638 = vmatprep.subr.bf16.mxu1 %v3154_v31  ;;  %v1363_v53 = vsel %vm3058_vm13, %v2411_v35, %v1362_v3  ;;  %v2728_v62 = vld [vmem:[#allocation2 + $0x38] ss:$8 sps:$4 sm:$0xff]   ;;  %v1370_v8 = vrot.slane %v3150_v57, 5  ;;  %v1120_v63 = vsel %vm2981_vm9, %v3160_v19, %v3157_v17  ;;  %v1167_v0 = vshll.u32 %v1099_v51, 16  ;;  %v3225_v12 = vld [vmem:[#allocation2 + $0x3c] sm:$0x1] }
  0x66   : > { %v2418_v42 = vcombine.low %v1359_v43, %v1363_v53  ;;  %v1173_v4 = vshll.u32 %v3183_v26, 16  ;;  %v1103_v33 = vld [vmem:[#allocation2 + $0x38] sm:$0xf]  ;;  %2599 = vmatmul.mubr.msk.bf16.gmra.mxu1 %vm603_vm10, %v2728_v62  ;;  %v3216_v30 = vrot.slane %v1156_v23, 4  ;;  %v1178_v55 = vshrl.u32 %v1101_v58, 16  ;;  %v2734_v53 = vld [vmem:[#allocation3 + $0x70] sm:$0xff]  }
  0x67   : > { %2571 = vmatmul.mubr.msk.bf16.vlgmr.msra.gmra.mxu0 %vm603_vm10, %v2363_v24  ;;  %v1366_v24 = vrot.slane %v3129_v52, 5  ;;  %v1371_v57 = vsel %vm3058_vm13, %v2413_v38, %v1370_v8  ;;  %v1134_v10 = vsel %vm2981_vm9, %v3174_v47, %v3162_v11  ;;  %v1169_v60 = vrot.slane %v1167_v0, 5  ;;  %v1105_v17 = vld [vmem:[#allocation2 + $0x40] sm:$0xf]  ;;  %v1336_v25 = vld [vmem:[#allocation2 + $0x28] sm:$0xe] }
  0x68   : > { %2579 = vmatpush3.bf16.msra.mxu0 %v3042_v9  ;;  %2582 = vmatprep.mubr.msk.bf16.mxu0 %vm603_vm10, %v2380_v20  ;;  %v2383_v9 = vcombine.low %v3168_v44, %v3172_v45  ;;  %v1164_v20 = vshrl.u32 %v1099_v51, 16  ;;  %v1181_v5 = vshll.u32 %v1101_v58, 16  ;;  %v1180_v18 = vrot.slane %v1178_v55, 4  ;;  %v1337_v41 = vld [vmem:[#allocation2 + $0x30] sm:$0xe]  ;;  %v3236_v47 = vld [vmem:[#allocation3 + $0x68] sm:$0xff]  }
  0x69   : > { %2580 = vmatprep.subr.bf16.mxu0 %v2721_v16  ;;  %v1367_v52 = vsel %vm3058_vm13, %v2412_v56, %v1366_v24  ;;  %2618 = vmatprep.mubr.msk.bf16.mxu1 %vm603_vm10, %v2418_v42  ;;  %v1187_v29 = vshll.u32 %v3203_v61, 16  ;;  %v1192_v15 = vshrl.u32 %v1103_v33, 16  ;;  %v3230_v22 = vrot.slane %v1173_v4, 5  ;;  %v1338_v35 = vld [vmem:[#allocation2 + $0x38] sm:$0xe] }
  0x6a   : > { %v1166_v27 = vrot.slane %v1164_v20, 4  ;;  %v2419_v6 = vcombine.low %v1367_v52, %v1371_v57  ;;  %v1183_v11 = vrot.slane %v1181_v5, 5  ;;  %v1195_v39 = vshll.u32 %v1103_v33, 16  ;;  %v3249_v52 = vld [vmem:[#allocation2 + $0x40] sm:$0xe] }
  0x6b   : > { %v1194_v48 = vrot.slane %v1192_v15, 4  ;;  %v1201_v2 = vshll.u32 %v3225_v12, 16  ;;  %v1206_v50 = vshrl.u32 %v1105_v17, 16  ;;  %v1209_v51 = vshll.u32 %v1105_v17, 16  ;;  %v3280_v55 = vld [vmem:[#allocation2 + $0x14] sm:$0x1] }
  0x6c   : > { %2581 = vmatpush3.bf16.msra.mxu0 %v2721_v16  ;;  %v300_v16 = vsel %vm2898_vm5, 0, %v299_v7  ;;  %v1170_v19 = vor.u32 %v1169_v60, %v1166_v27  ;;  %v1184_v23 = vor.u32 %v1183_v11, %v1180_v18  ;;  %v1189_v43 = vrot.slane %v1187_v29, 5  ;;  %v1631_v27 = vld [vmem:[#allocation2 + $0x10] sm:$0xf]  ;;  %v3290_v17 = vld [vmem:[#allocation2 + $0x24] sm:$0x1] }
  0x6d   : > { %2602 = vmatprep.subr.bf16.mxu0 %v2723_v54  ;;  %301 = vst [vmem:[#allocation2 + $0x44] sm:$0x1] %v300_v16  ;;  %v1197_v56 = vrot.slane %v1195_v39, 5  ;;  %v1208_v37 = vrot.slane %v1206_v50, 4  ;;  %v1211_v13 = vrot.slane %v1209_v51, 5  ;;  %v1374_v24 = vrot.slane %v3183_v26, 5 }
  0x6e   : > { %v1171_v3 = vrot.slane %v1170_v19, 4  ;;  %v2400_v38 = vcombine.low %v1120_v63, %v1134_v10  ;;  %v1185_v58 = vrot.slane %v1184_v23, 4  ;;  %v2415_v42 = vrot.slane %v1337_v41, 9  ;;  %2619 = vmatmul.mubr.msk.bf16.vlgmr.msra.gmra.mxu1 %vm603_vm10, %v2419_v6  ;;  %v1633_v10 = vld [vmem:[#allocation2 + $0x18] sm:$0xf] }
  0x6f   : > { %2583 = vmatmul.mubr.msk.bf16.vlgmr.msra.gmra.mxu0 %vm603_vm10, %v2381_v34  ;;  %v2414_v34 = vrot.slane %v1336_v25, 9  ;;  %v1198_v62 = vor.u32 %v1197_v56, %v1194_v48  ;;  %v1378_v20 = vrot.slane %v3203_v61, 5  ;;  %v1162_v26 = vsel %vm2981_vm9, %v3216_v30, %v3189_v36  ;;  %2639 = vmatpush3.bf16.msra.mxu1 %v3154_v31  ;;  %v1637_v25 = vld [vmem:[#allocation2 + $0x28] sm:$0xf]  ;;  %v3292_v11 = vld [vmem:[#allocation2 + $0x2c] sm:$0x1] }
  0x70   : > { %2603 = vmatpush3.bf16.msra.mxu0 %v2723_v54  ;;  %2586 = vmatprep.mubr.msk.bf16.mxu0 %vm603_vm10, %v2382_v46  ;;  %v1148_v54 = vsel %vm2981_vm9, %v3178_v59, %v3180_v14  ;;  %v1212_v46 = vor.u32 %v1211_v13, %v1208_v37  ;;  %v1176_v59 = vsel %vm2981_vm9, %v1171_v3, %v3230_v22  ;;  %v3258_v14 = vrot.slane %v1201_v2, 5 }
  0x71   : > { %2604 = vmatprep.subr.bf16.mxu0 %v2726_v32  ;;  %v1375_v8 = vsel %vm3058_vm13, %v2414_v34, %v1374_v24  ;;  %v2416_v63 = vrot.slane %v1338_v35, 9  ;;  %v1190_v61 = vsel %vm2981_vm9, %v1185_v58, %v1189_v43  ;;  %v3264_v4 = vrot.slane %v1198_v62, 4  ;;  %2640 = vmatprep.subr.bf16.mxu1 %v2734_v53  ;;  %v2732_v35 = vld [vmem:[#allocation3 + $0x60] sm:$0xff]  }
  0x72   : > { %v1379_v36 = vsel %vm3058_vm13, %v2415_v42, %v1378_v20  ;;  %v1382_v7 = vrot.slane %v3225_v12, 5  ;;  %v3273_v31 = vrot.slane %v1212_v46, 4  ;;  %v2417_v30 = vrot.slane %v3249_v52, 9  ;;  %v1635_v12 = vld [vmem:[#allocation2 + $0x20] sm:$0xf]  ;;  %v3303_v46 = vld [vmem:[#allocation3 + $0x88] sm:$0xff]  }
  0x73   : > { %v2401_v57 = vcombine.low %v1148_v54, %v1162_v26  ;;  %v1648_v21 = vshrl.u32 %v1631_v27, 16  ;;  %v1657_v6 = vshll.u32 %v3280_v55, 16  ;;  %v1662_v60 = vshrl.u32 %v1633_v10, 16  ;;  %2641 = vmatpush3.bf16.msra.mxu1 %v2734_v53 }
  0x74   : > { %2605 = vmatpush3.bf16.msra.mxu0 %v2726_v32  ;;  %v437_v0 = vld [vmem:[#allocation2 + $0x44] sm:$0x1]  ;;  %v2420_v32 = vcombine.low %v1375_v8, %v1379_v36  ;;  %v2402_v44 = vcombine.low %v1176_v59, %v1190_v61  ;;  %v1383_v45 = vsel %vm3058_vm13, %v2416_v63, %v1382_v7  ;;  %v1671_v5 = vshll.u32 %v3284_v1, 16 }
  0x75   : > { %2626 = vmatprep.subr.bf16.mxu0 %v3236_v47  ;;  %v438_v33 = vsel %vm2888_vm4, %v373_v49, %v437_v0  ;;  %v1651_v49 = vshll.u32 %v1631_v27, 16  ;;  %v1650_v18 = vrot.slane %v1648_v21, 4  ;;  %v1659_v16 = vrot.slane %v1657_v6, 5  ;;  %v2735_v27 = vld [vmem:[#allocation2 + $0x10] ss:$8 sps:$4 sm:$0xff]  }
  0x76   : > { %439 = vst [vmem:[#allocation2 + $0x44] sm:$0x1] %v438_v33  ;;  %2622 = vmatprep.mubr.msk.bf16.mxu1 %vm603_vm10, %v2420_v32  ;;  %v1664_v15 = vrot.slane %v1662_v60, 4  ;;  %v1673_v22 = vrot.slane %v1671_v5, 5  ;;  %v1676_v39 = vshrl.u32 %v1635_v12, 16  ;;  %v1679_v41 = vshll.u32 %v1635_v12, 16 }
  0x77   : > { %2587 = vmatmul.mubr.msk.bf16.gmra.mxu0 %vm603_vm10, %v2383_v9  ;;  %v1665_v9 = vshll.u32 %v1633_v10, 16  ;;  %v1653_v29 = vrot.slane %v1651_v49, 5  ;;  %v1685_v2 = vshll.u32 %v3290_v17, 16  ;;  %v1690_v50 = vshrl.u32 %v1637_v25, 16  ;;  %v3316_v33 = vld [vmem:[#allocation2 + $0x34] sm:$0x1] }
  0x78   : > { %2606 = vmatprep.mubr.msk.bf16.mxu0 %vm603_vm10, %v2400_v38  ;;  %v1693_v51 = vshll.u32 %v1637_v25, 16  ;;  %v1678_v23 = vrot.slane %v1676_v39, 4  ;;  %v1681_v43 = vrot.slane %v1679_v41, 5  ;;  %v1699_v56 = vshll.u32 %v3292_v11, 16  ;;  %v1641_v32 = vld [vmem:[#allocation2 + $0x38] sm:$0xf] }
  0x79   : > { %v1667_v19 = vrot.slane %v1665_v9, 5  ;;  %v1654_v48 = vor.u32 %v1653_v29, %v1650_v18  ;;  %v1687_v13 = vrot.slane %v1685_v2, 5  ;;  %v1692_v34 = vrot.slane %v1690_v50, 4  ;;  %v1643_v6 = vld [vmem:[#allocation2 + $0x40] sm:$0xf] }
  0x7a   : > { %v1695_v24 = vrot.slane %v1693_v51, 5  ;;  %v1682_v42 = vor.u32 %v1681_v43, %v1678_v23  ;;  %v1204_v54 = vsel %vm2981_vm9, %v3264_v4, %v3258_v14  ;;  %v1701_v52 = vrot.slane %v1699_v56, 5  ;;  %v1639_v14 = vld [vmem:[#allocation2 + $0x30] sm:$0xf]  ;;  %v1645_v29 = vld [vmem:[#allocation2 + $0x48] sm:$0xf] }
  0x7b   : > { %v1668_v3 = vor.u32 %v1667_v19, %v1664_v15  ;;  %v1655_v37 = vrot.slane %v1654_v48, 4  ;;  %v1704_v21 = vshrl.u32 %v1639_v14, 16  ;;  %v1707_v49 = vshll.u32 %v1639_v14, 16  ;;  %v1872_v43 = vld [vmem:[#allocation2 + $0x10] sm:$0xe] }
  0x7c   : > { %v1696_v20 = vor.u32 %v1695_v24, %v1692_v34  ;;  %v1683_v63 = vrot.slane %v1682_v42, 4  ;;  %v1713_v60 = vshll.u32 %v3316_v33, 16  ;;  %v1735_v39 = vshll.u32 %v1643_v6, 16  ;;  %v2737_v24 = vld [vmem:[#allocation2 + $0x20] ss:$8 sps:$4 sm:$0xff]  }
  0x7d   : > { %v1106_v53 = vld [vmem:[#allocation2 + $0x44] sm:$0x1]  ;;  %v1669_v62 = vrot.slane %v1668_v3, 4  ;;  %v1660_v8 = vsel %vm2981_vm9, %v1655_v37, %v1659_v16  ;;  %v1706_v5 = vrot.slane %v1704_v21, 4  ;;  %v1709_v12 = vrot.slane %v1707_v49, 5 }
  0x7e   : > { %v1215_v38 = vshll.u32 %v1106_v53, 16  ;;  %v1386_v58 = vrot.slane %v1106_v53, 5  ;;  %v1697_v36 = vrot.slane %v1696_v20, 4  ;;  %v1688_v7 = vsel %vm2981_vm9, %v1683_v63, %v1687_v13  ;;  %v3326_v9 = vld [vmem:[#allocation2 + $0x44] sm:$0x1] }
  0x7f   : > { %2607 = vmatmul.mubr.msk.bf16.vlgmr.msra.gmra.mxu0 %vm603_vm10, %v2401_v57  ;;  %v3318_v57 = vld [vmem:[#allocation2 + $0x3c] sm:$0x1]  ;;  %v1732_v16 = vshrl.u32 %v1643_v6, 16  ;;  %v1715_v15 = vrot.slane %v1713_v60, 5  ;;  %v1710_v41 = vor.u32 %v1709_v12, %v1706_v5  ;;  %v1741_v50 = vshll.u32 %v3326_v9, 16 }
  0x80   : > { %2627 = vmatpush3.bf16.msra.mxu0 %v3236_v47  ;;  %2610 = vmatprep.mubr.msk.bf16.mxu0 %vm603_vm10, %v2402_v44  ;;  %v1217_v26 = vrot.slane %v1215_v38, 5  ;;  %v1387_v59 = vsel %vm3058_vm13, %v2417_v30, %v1386_v58  ;;  %v1674_v47 = vsel %vm2981_vm9, %v1669_v62, %v1673_v22  ;;  %v1702_v10 = vsel %vm2981_vm9, %v1697_v36, %v1701_v52  ;;  %v3330_v22 = vld [vmem:[#allocation2 + $0x4c] sm:$0x1]  ;;  %v1873_v13 = vld [vmem:[#allocation2 + $0x18] sm:$0xe] }
  0x81   : > { %2628 = vmatprep.subr.bf16.mxu0 %v2732_v35  ;;  %v2421_v61 = vcombine.low %v1383_v45, %v1387_v59  ;;  %v2438_v0 = vcombine.low %v1660_v8, %v1674_v47  ;;  %v1718_v44 = vshrl.u32 %v1641_v32, 16  ;;  %v1721_v45 = vshll.u32 %v1641_v32, 16  ;;  %v2739_v59 = vld [vmem:[#allocation3 + $0x80] sm:$0xff]   ;;  %v1874_v36 = vld [vmem:[#allocation2 + $0x20] sm:$0xe] }
  0x82   : > { %v1218_v4 = vsel %vm2981_vm9, %v3273_v31, %v1217_v26  ;;  %v2439_v31 = vcombine.low %v1688_v7, %v1702_v10  ;;  %v1727_v18 = vshll.u32 %v3318_v57, 16  ;;  %v1734_v2 = vrot.slane %v1732_v16, 4  ;;  %v1876_v7 = vld [vmem:[#allocation2 + $0x30] sm:$0xe]  ;;  %v2740_v32 = vld [vmem:[#allocation2 + $0x40] ss:$8 sps:$4 sm:$0xff]  }
  0x83   : > { %v2403_v30 = vcombine.low %v1204_v54, %v1218_v4  ;;  %2623 = vmatmul.mubr.msk.bf16.gmra.mxu1 %vm603_vm10, %v2421_v61  ;;  %v1720_v25 = vrot.slane %v1718_v44, 4  ;;  %v1723_v19 = vrot.slane %v1721_v45, 5  ;;  %v1746_v3 = vshrl.u32 %v1645_v29, 16  ;;  %v2738_v54 = vld [vmem:[#allocation2 + $0x30] ss:$8 sps:$4 sm:$0xff]  }
  0x84   : > { %2629 = vmatpush3.bf16.msra.mxu0 %v2732_v35  ;;  %2642 = vmatprep.mubr.msk.bf16.mxu1 %vm603_vm10, %v2438_v0  ;;  %v1729_v48 = vrot.slane %v1727_v18, 5  ;;  %v1737_v35 = vrot.slane %v1735_v39, 5  ;;  %v1749_v23 = vshll.u32 %v1645_v29, 16  ;;  %v1711_v56 = vrot.slane %v1710_v41, 4  ;;  %v1877_v21 = vld [vmem:[#allocation2 + $0x38] sm:$0xe] }
  0x85   : > { %2650 = vmatprep.subr.bf16.mxu0 %v3303_v46  ;;  %v1724_v51 = vor.u32 %v1723_v19, %v1720_v25  ;;  %v1743_v53 = vrot.slane %v1741_v50, 5  ;;  %v1755_v37 = vshll.u32 %v3330_v22, 16  ;;  %v1898_v34 = vrot.slane %v3280_v55, 5  ;;  %v1878_v18 = vld [vmem:[#allocation2 + $0x40] sm:$0xe] }
  0x86   : > { %v1738_v58 = vor.u32 %v1737_v35, %v1734_v2  ;;  %v1748_v62 = vrot.slane %v1746_v3, 4  ;;  %v1751_v42 = vrot.slane %v1749_v23, 5  ;;  %v1716_v8 = vsel %vm2981_vm9, %v1711_v56, %v1715_v15  ;;  %v1879_v16 = vld [vmem:[#allocation2 + $0x48] sm:$0xe]  ;;  %v2745_v35 = vld [vmem:[%s3503_s3 + $0x18] sm:$0xff]   ;;  %v2746_v3 = vld [vmem:[%s3503_s3 + $0x10] sm:$0xff]  }
  0x87   : > { %2611 = vmatmul.mubr.msk.bf16.gmra.mxu0 %vm603_vm10, %v2403_v30  ;;  %v1725_v38 = vrot.slane %v1724_v51, 4  ;;  %v1757_v20 = vrot.slane %v1755_v37, 5  ;;  %v2448_v52 = vrot.slane %v1872_v43, 9  ;;  %v1902_v26 = vrot.slane %v3284_v1, 5  ;;  %v1875_v1 = vld [vmem:[#allocation2 + $0x28] sm:$0xe] }
  0x88   : > { %2630 = vmatprep.mubr.msk.bf16.mxu0 %vm603_vm10, %v2735_v27  ;;  %v1739_v55 = vrot.slane %v1738_v58, 4  ;;  %v1752_v63 = vor.u32 %v1751_v42, %v1748_v62  ;;  %v2449_v61 = vrot.slane %v1873_v13, 9  ;;  %v1906_v6 = vrot.slane %v3290_v17, 5  ;;  %v2744_v51 = vld [vmem:[%s3503_s3 + $0x20] sm:$0xff]   ;;  %v2747_v23 = vld [vmem:[%s3503_s3 + $0x8] sm:$0xff]  }
  0x89   : > { %v1730_v47 = vsel %vm2981_vm9, %v1725_v38, %v1729_v48  ;;  %v1899_v27 = vsel %vm3058_vm13, %v2448_v52, %v1898_v34  ;;  %v1910_v60 = vrot.slane %v3292_v11, 5  ;;  %v2452_v40 = vrot.slane %v1876_v7, 9  ;;  %v2748_v43 = vld [vmem:[%s3503_s3] sm:$0xff]  }
  0x8a   : > { %v2440_v0 = vcombine.low %v1716_v8, %v1730_v47  ;;  %v1744_v14 = vsel %vm2981_vm9, %v1739_v55, %v1743_v53  ;;  %v1753_v4 = vrot.slane %v1752_v63, 4  ;;  %v1903_v10 = vsel %vm3058_vm13, %v2449_v61, %v1902_v26 }
  0x8b   : > { %2643 = vmatmul.mubr.msk.bf16.vlgmr.msra.gmra.mxu1 %vm603_vm10, %v2439_v31  ;;  %v2451_v31 = vrot.slane %v1875_v1, 9  ;;  %v2456_v44 = vcombine.low %v1899_v27, %v1903_v10  ;;  %v1914_v45 = vrot.slane %v3316_v33, 5  ;;  %v2453_v5 = vrot.slane %v1877_v21, 9 }
  0x8c   : > { %2646 = vmatprep.mubr.msk.bf16.mxu1 %vm603_vm10, %v2440_v0  ;;  %v1758_v30 = vsel %vm2981_vm9, %v1753_v4, %v1757_v20  ;;  %v1918_v12 = vrot.slane %v3318_v57, 5  ;;  %v2454_v57 = vrot.slane %v1878_v18, 9  ;;  %v1922_v19 = vrot.slane %v3326_v9, 5  ;;  %v2741_v9 = vld [vmem:[%s3503_s3 + $0x38] sm:$0xff]  }
  0x8d   : > { %v2441_v49 = vcombine.low %v1744_v14, %v1758_v30  ;;  %v1911_v11 = vsel %vm3058_vm13, %v2451_v31, %v1910_v60  ;;  %v1915_v29 = vsel %vm3058_vm13, %v2452_v40, %v1914_v45  ;;  %v2455_v39 = vrot.slane %v1879_v16, 9  ;;  %2662 = vmatprep.subr.bf16.mxu1 %v2741_v9 }
  0x8e   : > { %v1919_v33 = vsel %vm3058_vm13, %v2453_v5, %v1918_v12  ;;  %v1926_v41 = vrot.slane %v3330_v22, 5  ;;  %v1923_v48 = vsel %vm3058_vm13, %v2454_v57, %v1922_v19  ;;  %2663 = vmatpush3.bf16.msra.mxu1 %v2741_v9  ;;  %v2742_v22 = vld [vmem:[%s3503_s3 + $0x30] sm:$0xff]  }
  0x8f   : > { %2631 = vmatmul.mubr.msk.bf16.vlgmr.msra.gmra.mxu0 %vm603_vm10, %v2737_v24  ;;  %v2458_v25 = vcombine.low %v1915_v29, %v1919_v33  ;;  %2664 = vmatprep.subr.bf16.mxu1 %v2742_v22 }
  0x90   : > { %2651 = vmatpush3.bf16.msra.mxu0 %v3303_v46  ;;  %2634 = vmatprep.mubr.msk.bf16.mxu0 %vm603_vm10, %v2738_v54  ;;  %v2450_v46 = vrot.slane %v1874_v36, 9  ;;  %v1927_v2 = vsel %vm3058_vm13, %v2455_v39, %v1926_v41 }
  0x91   : > { %2652 = vmatprep.subr.bf16.mxu0 %v2739_v59  ;;  %v2459_v50 = vcombine.low %v1923_v48, %v1927_v2 }
  0x92   : > { %v1907_v17 = vsel %vm3058_vm13, %v2450_v46, %v1906_v6  ;;  %2665 = vmatpush3.bf16.msra.mxu1 %v2742_v22 }
  0x93   : > { %2647 = vmatmul.mubr.msk.bf16.gmra.mxu1 %vm603_vm10, %v2441_v49  ;;  %v2457_v15 = vcombine.low %v1907_v17, %v1911_v11  ;;  %2666 = vmatprep.subr.bf16.mxu1 %v2743_v28 }
  0x94   : > { %2653 = vmatpush3.bf16.msra.mxu0 %v2739_v59 }
  0x96   : > { %2667 = vmatpush3.bf16.msra.mxu1 %v2743_v28 }
  0x97   : > { %2635 = vmatmul.mubr.msk.bf16.gmra.mxu0 %vm603_vm10, %v2740_v32  ;;  %2668 = vmatprep.subr.bf16.mxu1 %v2744_v51 }
  0x98   : > { %2654 = vmatprep.mubr.msk.bf16.mxu0 %vm603_vm10, %v2456_v44 }
  0x9a   : > { %2669 = vmatpush3.bf16.msra.mxu1 %v2744_v51 }
  0x9b   : > { %2670 = vmatprep.subr.bf16.mxu1 %v2745_v35 }
  0x9e   : > { %2671 = vmatpush3.bf16.msra.mxu1 %v2745_v35 }
  0x9f   : > { %2655 = vmatmul.mubr.msk.bf16.vlgmr.msra.gmra.mxu0 %vm603_vm10, %v2457_v15  ;;  %2672 = vmatprep.subr.bf16.mxu1 %v2746_v3 }
  0xa0   : > { %2658 = vmatprep.mubr.msk.bf16.mxu0 %vm603_vm10, %v2458_v25 }
  0xa2   : > { %2673 = vmatpush3.bf16.msra.mxu1 %v2746_v3 }
  0xa3   : > { %2674 = vmatprep.subr.bf16.mxu1 %v2747_v23 }
  0xa6   : > { %2675 = vmatpush3.bf16.msra.mxu1 %v2747_v23 }
  0xa7   : > { %2659 = vmatmul.mubr.msk.bf16.gmra.mxu0 %vm603_vm10, %v2459_v50  ;;  %2676 = vmatprep.subr.bf16.mxu1 %v2748_v43 }
  0xaa   : > { %2677 = vmatpush3.bf16.msra.mxu1 %v2748_v43 }
 0x109   : > { %v2560_v56 = vpop.f32.mrf.mxu0 }
 0x10b   : > { %v650_v53 = vpop.f32.mrf.mxu0 }
 0x10d   : > { %v2561_v13 = vpop.f32.mrf.mxu0 }
 0x10f   : > { %v653_v38 = vpop.f32.mrf.mxu0 }
 0x116   : > { %v3402_v37 = vpop.f32.mrf.mxu1 }
 0x118   : > { %v775_v34 = vpop.f32.mrf.mxu1 }
 0x11a   : > { %v3404_v24 = vpop.f32.mrf.mxu1 }
 0x11c   : > { %v3406_v58 = vpop.f32.mrf.mxu1 }
 0x11e   : > { %v2596_v62 = vpop.f32.mrf.mxu1 }
 0x11f   : > { %v2564_v42 = vpop.f32.mrf.mxu0 }
 0x120   : > { %v1052_v54 = vpop.f32.mrf.mxu1 }
 0x121   : > { %v666_v8 = vpop.f32.mrf.mxu0 }
 0x122   : > { %v2597_v52 = vpop.f32.mrf.mxu1 }
 0x123   : > { %v2565_v20 = vpop.f32.mrf.mxu0 }
 0x124   : > { %v1055_v47 = vpop.f32.mrf.mxu1 }
 0x125   : > { %v669_v26 = vpop.f32.mrf.mxu0 }
 0x126   : > { %v3408_v61 = vpop.f32.mrf.mxu1 }
 0x127   : > { %v2572_v59 = vpop.f32.mrf.mxu0 }
 0x128   : > { %v3410_v36 = vpop.f32.mrf.mxu1  ;;  %v768_v19 = vadd.f32 %v2572_v59, %v2560_v56 }
 0x129   : > { %v759_v55 = vpop.f32.mrf.mxu0 }
 0x12a   : > { %v3412_v4 = vpop.f32.mrf.mxu1  ;;  %v760_v25 = vadd.f32 %v759_v55, %v650_v53  ;;  %v784_v53 = vadd.f32 %v3402_v37, %v2564_v42 }
 0x12b   : > { %v2573_v63 = vpop.f32.mrf.mxu0 }
 0x12c   : > { %v3414_v7 = vpop.f32.mrf.mxu1  ;;  %v771_v41 = vadd.f32 %v2573_v63, %v2561_v13  ;;  %v787_v13 = vadd.f32 %v3404_v24, %v2565_v20 }
 0x12d   : > { %v762_v0 = vpop.f32.mrf.mxu0 }
 0x12e   : > { %v2620_v30 = vpop.f32.mrf.mxu1  ;;  %v763_v22 = vadd.f32 %v762_v0, %v653_v38  ;;  %v779_v38 = vadd.f32 %v3406_v58, %v669_v26 }
 0x12f   : > { %v2584_v14 = vpop.f32.mrf.mxu0 }
 0x130   : > { %v1462_v21 = vpop.f32.mrf.mxu1  ;;  %v956_v2 = vadd.f32 %v2584_v14, %v768_v19 }
 0x131   : > { %v923_v1 = vpop.f32.mrf.mxu0 }
 0x132   : > { %v2621_v6 = vpop.f32.mrf.mxu1  ;;  %v954_v48 = vadd.f32 %v923_v1, %v760_v25  ;;  %v1085_v23 = vadd.f32 %v2596_v62, %v956_v2 }
 0x133   : > { %v2585_v32 = vpop.f32.mrf.mxu0 }
 0x134   : > { %v1465_v44 = vpop.f32.mrf.mxu1  ;;  %v957_v28 = vadd.f32 %v2585_v32, %v771_v41  ;;  %v1083_v35 = vadd.f32 %v1052_v54, %v954_v48 }
 0x135   : > { %v926_v27 = vpop.f32.mrf.mxu0 }
 0x136   : > { %v955_v3 = vadd.f32 %v926_v27, %v763_v22 }
 0x137   : > { %v2588_v10 = vpop.f32.mrf.mxu0 }
 0x138   : > { %v1084_v55 = vadd.f32 %v1055_v47, %v955_v3  ;;  %v960_v0 = vadd.f32 %v2588_v10, %v784_v53 }
 0x139   : > { %v939_v49 = vpop.f32.mrf.mxu0 }
 0x13a   : > { %v1089_v24 = vadd.f32 %v3408_v61, %v960_v0 }
 0x13b   : > { %v2589_v46 = vpop.f32.mrf.mxu0 }
 0x13c   : > { %v961_v62 = vadd.f32 %v2589_v46, %v787_v13 }
 0x13d   : > { %v942_v31 = vpop.f32.mrf.mxu0 }
 0x13e   : > { %v1090_v58 = vadd.f32 %v3412_v4, %v961_v62 }
 0x13f   : > { %v2608_v60 = vpop.f32.mrf.mxu0 }
 0x140   : > { %v1326_v56 = vadd.f32 %v2608_v60, %v1085_v23 }
 0x141   : > { %v1293_v40 = vpop.f32.mrf.mxu0 }
 0x143   : > { %v2609_v45 = vpop.f32.mrf.mxu0  ;;  %v3416_v5 = vpop.f32.mrf.mxu1 }
 0x144   : > { %3517 = vst [vmem:[#allocation6_spill] sm:$0xff] %v3416_v5  ;;  %v1086_v5 = vadd.f32 %v2597_v52, %v957_v28 }
 0x145   : > { %v1296_v12 = vpop.f32.mrf.mxu0  ;;  %v3418_v17 = vpop.f32.mrf.mxu1 }
 0x146   : > { %3518 = vst [vmem:[#allocation7_spill] sm:$0xff] %v3418_v17  ;;  %v1324_v17 = vadd.f32 %v1293_v40, %v1083_v35  ;;  %v1327_v14 = vadd.f32 %v2609_v45, %v1086_v5  ;;  %v1325_v27 = vadd.f32 %v1296_v12, %v1084_v55 }
 0x147   : > { %v2612_v11 = vpop.f32.mrf.mxu0  ;;  %v3420_v18 = vpop.f32.mrf.mxu1 }
 0x148   : > { %3519 = vst [vmem:[#allocation8_spill] sm:$0xff] %v3420_v18  ;;  %v1493_v32 = vadd.f32 %v1462_v21, %v1324_v17  ;;  %v1496_v42 = vadd.f32 %v2621_v6, %v1327_v14  ;;  %v1494_v26 = vadd.f32 %v1465_v44, %v1325_v27  ;;  %v1330_v46 = vadd.f32 %v2612_v11, %v1089_v24 }
 0x149   : > { %v1309_v29 = vpop.f32.mrf.mxu0  ;;  %v3422_v33 = vpop.f32.mrf.mxu1 }
 0x14a   : > { %3520 = vst [vmem:[#allocation9_spill] sm:$0xff] %v3422_v33  ;;  %v776_v33 = vadd.f32 %v775_v34, %v666_v8  ;;  %v959_v34 = vadd.f32 %v942_v31, %v779_v38  ;;  %v1495_v8 = vadd.f32 %v2620_v30, %v1326_v56 }
 0x14b   : > { %v2613_v16 = vpop.f32.mrf.mxu0  ;;  %v2644_v57 = vpop.f32.mrf.mxu1 }
 0x14c   : > { %v958_v63 = vadd.f32 %v939_v49, %v776_v33  ;;  %v1088_v21 = vadd.f32 %v3414_v7, %v959_v34  ;;  %v1331_v30 = vadd.f32 %v2613_v16, %v1090_v58  ;;  %v2466_v16 = vld [vmem:[%s3502_s2] ss:$0 sm:$0xff] }
 0x14d   : > { %v1312_v15 = vpop.f32.mrf.mxu0  ;;  %v1833_v9 = vpop.f32.mrf.mxu1  ;;  %v3521_v61 = vld [vmem:[#allocation7_spill] sm:$0xff] }
 0x14e   : > { %v1087_v37 = vadd.f32 %v3410_v36, %v958_v63  ;;  %v1329_v36 = vadd.f32 %v1312_v15, %v1088_v21 }
 0x14f   : > { %v2632_v39 = vpop.f32.mrf.mxu0  ;;  %v2645_v18 = vpop.f32.mrf.mxu1  ;;  %v3523_v41 = vld [vmem:[#allocation8_spill] sm:$0xff] }
 0x150   : > { %v1625_v20 = vadd.f32 %v2632_v39, %v1495_v8  ;;  %v1328_v10 = vadd.f32 %v1309_v29, %v1087_v37  ;;  %v3522_v39 = vld [vmem:[#allocation6_spill] sm:$0xff]  ;;  %v1500_v48 = vadd.f32 %v3523_v41, %v1331_v30 }
 0x151   : > { %v1592_v50 = vpop.f32.mrf.mxu0  ;;  %v1836_v54 = vpop.f32.mrf.mxu1  ;;  %v1499_v4 = vadd.f32 %v3522_v39, %v1330_v46  ;;  %v2467_v46 = vld [vmem:[%s3504_s4] ss:$0 sm:$0xff] }
 0x152   : > { %v1623_v60 = vadd.f32 %v1592_v50, %v1493_v32  ;;  %v1866_v6 = vadd.f32 %v2644_v57, %v1625_v20  ;;  %v1497_v33 = vadd.f32 %v3521_v61, %v1328_v10  ;;  %v3524_v57 = vld [vmem:[#allocation9_spill] sm:$0xff] }
 0x153   : > { %v2633_v51 = vpop.f32.mrf.mxu0  ;;  %v2648_v47 = vpop.f32.mrf.mxu1  ;;  %v1498_v2 = vadd.f32 %v3524_v57, %v1329_v36 }
 0x154   : > { %v1626_v40 = vadd.f32 %v2633_v51, %v1496_v42  ;;  %v1864_v45 = vadd.f32 %v1833_v9, %v1623_v60 }
 0x155   : > { %v1595_v43 = vpop.f32.mrf.mxu0  ;;  %v1849_v12 = vpop.f32.mrf.mxu1 }
 0x156   : > { %v1624_v5 = vadd.f32 %v1595_v43, %v1494_v26  ;;  %v1867_v25 = vadd.f32 %v2645_v18, %v1626_v40 }
 0x157   : > { %v2636_v59 = vpop.f32.mrf.mxu0  ;;  %v2649_v9 = vpop.f32.mrf.mxu1 }
 0x158   : > { %v1865_v7 = vadd.f32 %v1836_v54, %v1624_v5  ;;  %v1629_v50 = vadd.f32 %v2636_v59, %v1499_v4 }
 0x159   : > { %v1608_v1 = vpop.f32.mrf.mxu0  ;;  %v1852_v55 = vpop.f32.mrf.mxu1 }
 0x15a   : > { %v1627_v11 = vadd.f32 %v1608_v1, %v1497_v33  ;;  %v1870_v13 = vadd.f32 %v2648_v47, %v1629_v50 }
 0x15b   : > { %v2637_v52 = vpop.f32.mrf.mxu0 }
 0x15c   : > { %v1630_v18 = vadd.f32 %v2637_v52, %v1500_v48  ;;  %v1868_v43 = vadd.f32 %v1849_v12, %v1627_v11 }
 0x15d   : > { %v1611_v49 = vpop.f32.mrf.mxu0 }
 0x15e   : > { %v1628_v53 = vadd.f32 %v1611_v49, %v1498_v2  ;;  %v1871_v38 = vadd.f32 %v2649_v9, %v1630_v18  ;;  %v2204_v18 = vlaneseq }
 0x15f   : > { %v2656_v31 = vpop.f32.mrf.mxu0 }
 0x160   : > { %v2035_v44 = vadd.f32 %v2656_v31, %v1866_v6  ;;  %v1869_v27 = vadd.f32 %v1852_v55, %v1628_v53 }
 0x161   : > { %v2002_v17 = vpop.f32.mrf.mxu0 }
 0x162   : > { %v2033_v19 = vadd.f32 %v2002_v17, %v1864_v45  ;;  %v2050_v3 = vadd.f32 %v2466_v16, %v2035_v44 }
 0x163   : > { %v2657_v29 = vpop.f32.mrf.mxu0 }
 0x164   : > { %v2036_v15 = vadd.f32 %v2657_v29, %v1867_v25  ;;  %v2048_v28 = vadd.f32 %v2466_v16, %v2033_v19  ;;  %v2058_v59 = vmax.f32 %v2050_v3, 0.0 }
 0x165   : > { %v2005_v22 = vpop.f32.mrf.mxu0 }
 0x166   : > { %v2051_v51 = vadd.f32 %v2466_v16, %v2036_v15  ;;  %v2034_v35 = vadd.f32 %v2005_v22, %v1865_v7  ;;  %v2056_v0 = vmax.f32 %v2048_v28, 0.0 }
 0x167   : > { %v2660_v23 = vpop.f32.mrf.mxu0 }
 0x168   : > { %v2049_v56 = vadd.f32 %v2466_v16, %v2034_v35  ;;  %v2059_v63 = vmax.f32 %v2051_v51, 0.0  ;;  %v2039_v62 = vadd.f32 %v2660_v23, %v1870_v13  ;;  %v2205_v23 = vand.u32 127, %v2204_v18 }
 0x169   : > { %v2018_v14 = vpop.f32.mrf.mxu0 }
 0x16a   : > { %v2057_v54 = vmax.f32 %v2049_v56, 0.0  ;;  %v2037_v1 = vadd.f32 %v2018_v14, %v1868_v43  ;;  %v2065_v52 = vpack.c.bf16 %v2059_v63, %v2058_v59  ;;  %v2054_v20 = vadd.f32 %v2466_v16, %v2039_v62 }
 0x16b   : > { %v2661_v32 = vpop.f32.mrf.mxu0  ;;  %vm2206_vm14 = vcmp.ge.s32.totalorder %v2205_v23, 2  ;;  %vm2207_vm15 = vcmp.lt.s32.totalorder %v2205_v23, 6 }
 0x16c   : > { %v2040_v34 = vadd.f32 %v2661_v32, %v1871_v38  ;;  %v2064_v8 = vpack.c.bf16 %v2057_v54, %v2056_v0  ;;  %v2052_v42 = vadd.f32 %v2466_v16, %v2037_v1  ;;  %v2062_v10 = vmax.f32 %v2054_v20, 0.0  ;;  %vm3460_vm0 = vmand %vm2206_vm14, %vm2207_vm15 }
 0x16d   : > { %v2021_v37 = vpop.f32.mrf.mxu0 }
 0x16e   : > { %v2055_v60 = vadd.f32 %v2466_v16, %v2040_v34  ;;  %v2038_v24 = vadd.f32 %v2021_v37, %v1869_v27  ;;  %2678 = vmatprep.mubr.bf16.mxu1 %v2064_v8  ;;  %v2060_v58 = vmax.f32 %v2052_v42, 0.0 }
 0x16f   : > { %2679 = vmatmul.mubr.bf16.vlgmr.msra.gmra.mxu1 %v2065_v52 }
 0x170   : > { %v2053_v47 = vadd.f32 %v2466_v16, %v2038_v24  ;;  %v2063_v49 = vmax.f32 %v2055_v60, 0.0 }
 0x172   : > { %v2061_v26 = vmax.f32 %v2053_v47, 0.0  ;;  %v2067_v21 = vpack.c.bf16 %v2063_v49, %v2062_v10 }
 0x174   : > { %v2066_v40 = vpack.c.bf16 %v2061_v26, %v2060_v58 }
 0x176   : > { %2682 = vmatprep.mubr.bf16.mxu1 %v2066_v40 }
 0x177   : > { %2683 = vmatmul.mubr.bf16.gmra.mxu1 %v2067_v21 }
 0x22f   : > { %v2680_v31 = vpop.f32.mrf.mxu1 }
 0x230   : > { %v3441_v30 = vadd.f32 %v2680_v31, %v2467_v46 }
 0x231   : > { %v2173_v45 = vpop.f32.mrf.mxu1 }
 0x232   : > { %v2478_v5 = vmul.f32 -1.442695, %v3441_v30  ;;  %v3444_v36 = vadd.f32 %v2467_v46, %v2173_v45 }
 0x233   : > { %v2681_v6 = vpop.f32.mrf.mxu1 }
 0x234   : > { %2749 = vpow2.f32 %v2478_v5  ;;  %v2476_v12 = vmul.f32 -1.442695, %v3444_v36  ;;  %v3447_v17 = vadd.f32 %v2681_v6, %v2467_v46 }
 0x235   : > { %v2176_v61 = vpop.f32.mrf.mxu1 }
 0x236   : > { %2751 = vpow2.f32 %v2476_v12  ;;  %v2479_v33 = vmul.f32 -1.442695, %v3447_v17  ;;  %v3450_v25 = vadd.f32 %v2467_v46, %v2176_v61 }
 0x237   : > { %v2684_v19 = vpop.f32.mrf.mxu1 }
 0x238   : > { %2753 = vpow2.f32 %v2479_v33  ;;  %v2477_v39 = vmul.f32 -1.442695, %v3450_v25  ;;  %v3453_v4 = vadd.f32 %v2684_v19, %v2467_v46 }
 0x239   : > { %v2189_v44 = vpop.f32.mrf.mxu1 }
 0x23a   : > { %2755 = vpow2.f32 %v2477_v39  ;;  %v2482_v29 = vmul.f32 -1.442695, %v3453_v4  ;;  %v3456_v41 = vadd.f32 %v2467_v46, %v2189_v44 }
 0x23b   : > { %v2685_v48 = vpop.f32.mrf.mxu1 }
 0x23c   : > { %2757 = vpow2.f32 %v2482_v29  ;;  %v2480_v7 = vmul.f32 -1.442695, %v3456_v41  ;;  %v2201_v11 = vadd.f32 %v2685_v48, %v2467_v46 }
 0x23d   : > { %v2192_v16 = vpop.f32.mrf.mxu1 }
 0x23e   : > { %2759 = vpow2.f32 %v2480_v7  ;;  %v2483_v15 = vmul.f32 -1.442695, %v2201_v11  ;;  %v2193_v57 = vadd.f32 %v2467_v46, %v2192_v16 }
 0x240   : > { %2761 = vpow2.f32 %v2483_v15  ;;  %v2481_v2 = vmul.f32 -1.442695, %v2193_v57 }
 0x241   : > { %v2750_v50 = vpop.eup %2749 }
 0x242   : > { %v2235_v9 = vadd.f32 1.0, %v2750_v50  ;;  %2763 = vpow2.f32 %v2481_v2 }
 0x243   : > { %v2752_v22 = vpop.eup %2751 }
 0x244   : > { %2765 = vrcp.f32 %v2235_v9  ;;  %v2233_v28 = vadd.f32 1.0, %v2752_v22 }
 0x245   : > { %v2754_v51 = vpop.eup %2753 }
 0x246   : > { %2767 = vrcp.f32 %v2233_v28  ;;  %v2236_v35 = vadd.f32 1.0, %v2754_v51 }
 0x247   : > { %v2756_v3 = vpop.eup %2755 }
 0x248   : > { %2769 = vrcp.f32 %v2236_v35  ;;  %v2234_v43 = vadd.f32 1.0, %v2756_v3 }
 0x249   : > { %v2758_v53 = vpop.eup %2757 }
 0x24a   : > { %2771 = vrcp.f32 %v2234_v43  ;;  %v2239_v56 = vadd.f32 1.0, %v2758_v53 }
 0x24b   : > { %v2760_v13 = vpop.eup %2759 }
 0x24c   : > { %2773 = vrcp.f32 %v2239_v56  ;;  %v2237_v55 = vadd.f32 1.0, %v2760_v13 }
 0x24d   : > { %v2762_v63 = vpop.eup %2761 }
 0x24e   : > { %2775 = vrcp.f32 %v2237_v55  ;;  %v2240_v14 = vadd.f32 1.0, %v2762_v63 }
 0x24f   : > { %v2764_v38 = vpop.eup %2763 }
 0x250   : > { %2777 = vrcp.f32 %v2240_v14  ;;  %v2238_v54 = vadd.f32 1.0, %v2764_v38 }
 0x251   : > { %v2766_v1 = vpop.eup %2765 }
 0x252   : > { %v2259_v59 = vsel %vm3460_vm0, %v2766_v1, %v3441_v30  ;;  %2779 = vrcp.f32 %v2238_v54 }
 0x253   : > { %v2768_v62 = vpop.eup %2767  ;;  %2268 = vst.msk [vmem:[%s239_s7 + $0x10] sm:$0xff] %vm2265_vm1, %v2259_v59 }
 0x254   : > { %v2257_v32 = vsel %vm3460_vm0, %v2768_v62, %v3444_v36 }
 0x255   : > { %v2770_v27 = vpop.eup %2769  ;;  %2266 = vst.msk [vmem:[%s239_s7] sm:$0xff] %vm2265_vm1, %v2257_v32 }
 0x256   : > { %v2260_v34 = vsel %vm3460_vm0, %v2770_v27, %v3447_v17 }
 0x257   : > { %v2772_v8 = vpop.eup %2771  ;;  %2269 = vst.msk [vmem:[%s239_s7 + $0x18] sm:$0xff] %vm2265_vm1, %v2260_v34 }
 0x258   : > { %v2258_v52 = vsel %vm3460_vm0, %v2772_v8, %v3450_v25 }
 0x259   : > { %v2774_v37 = vpop.eup %2773  ;;  %2267 = vst.msk [vmem:[%s239_s7 + $0x8] sm:$0xff] %vm2265_vm1, %v2258_v52 }
 0x25a   : > { %v2263_v42 = vsel %vm3460_vm0, %v2774_v37, %v3453_v4 }
 0x25b   : > { %v2776_v60 = vpop.eup %2775  ;;  %2272 = vst.msk [vmem:[%s239_s7 + $0x30] sm:$0xff] %vm2265_vm1, %v2263_v42 }
 0x25c   : > { %v2261_v24 = vsel %vm3460_vm0, %v2776_v60, %v3456_v41 }
 0x25d   : > { %v2778_v20 = vpop.eup %2777  ;;  %2270 = vst.msk [vmem:[%s239_s7 + $0x20] sm:$0xff] %vm2265_vm1, %v2261_v24 }
 0x25e   : > { %v2264_v47 = vsel %vm3460_vm0, %v2778_v20, %v2201_v11 }
 0x25f   : > { %v2780_v49 = vpop.eup %2779  ;;  %2273 = vst.msk [vmem:[%s239_s7 + $0x38] sm:$0xff] %vm2265_vm1, %v2264_v47 }
 0x260   : > { %v2262_v58 = vsel %vm3460_vm0, %v2780_v49, %v2193_v57 }
 0x261   : > { %2271 = vst.msk [vmem:[%s239_s7 + $0x28] sm:$0xff] %vm2265_vm1, %v2262_v58 }
 0x262 PF: > { %s16_s18 = sadd.s32 1, %s2817_s18  }
 0x263   : > { %p13_p1 = scmp.ge.s32.totalorder %s16_s18, 4  }
 0x265   :  { %15 = sbr.rel (!%p13_p1) target bundleno = 1 (0x1), region = 78 }
 0x26a   :  { %2295 = vsyncpa [#allocation4], 1 }
 0x26b   :  { %2297 = vsyncpa [#allocation4 + $0x1], 1 }

</bundles_post_ra>
